<compile_context>
chip_gen: v7x
topology: tpu7x:2x2x1
jax: 0.10.0
libtpu: 0.0.40
codegen_flags: <defaults>
</compile_context>

<pallas_src>
import jax
import jax.numpy as jnp
from jax.experimental import pallas as pl
from jax.experimental.pallas import tpu as pltpu

SELU_ALPHA = 1.6732632423543772848170429916717
SELU_SCALE = 1.0507009873554804934193349852946

# Cap on the packed-row tile: x block (tm, pack*F) + out block (tm, pack*O),
# double-buffered, plus resident weights stays < ~16 MiB at this cap.
_MAX_TM_PACKED = 4096


def _round_up(v, m):
    return ((v + m - 1) // m) * m


def _selu(v):
    # F.selu: scale * (x if x > 0 else alpha * (exp(x) - 1)), computed in f32.
    # exp arg clamped so the unselected branch (and padded rows) stay finite.
    return SELU_SCALE * jnp.where(
        v > 0, v, SELU_ALPHA * (jnp.exp(jnp.minimum(v, 0.0)) - 1.0))


def mlp_packed_kernel(x_ref,
                      w1_ref, b1_ref,
                      w2_ref, b2_ref,
                      w3_ref, b3_ref,
                      w4_ref, b4_ref,
                      o_ref):
    # One lane-dense batch tile per grid step.  Weight/bias blocks are tiny,
    # block-diagonal and VMEM-resident (constant index_map).  Accumulation,
    # bias add and SELU are f32; operand casts (no-op for f32 inputs) are
    # cheap VPU work hidden under the matmuls.
    h = _selu(jnp.dot(x_ref[...], w1_ref[...],
                      preferred_element_type=jnp.float32) + b1_ref[...])
    h = _selu(jnp.dot(h.astype(w2_ref.dtype), w2_ref[...],
                      preferred_element_type=jnp.float32) + b2_ref[...])
    h = _selu(jnp.dot(h.astype(w3_ref.dtype), w3_ref[...],
                      preferred_element_type=jnp.float32) + b3_ref[...])
    out = (jnp.dot(h.astype(w4_ref.dtype), w4_ref[...],
                   preferred_element_type=jnp.float32) + b4_ref[...])
    o_ref[...] = out.astype(o_ref.dtype)


def pack_params(params, pack, dtype=jnp.float32):
    """Block-diagonal expansion so `pack` logical rows share one lane-row.

    Each (in, out) weight becomes kron(I_pack, W) of shape
    (pack*in, pack*out); each (1, out) bias is tiled to (1, pack*out).
    Biases stay float32 (they add onto the f32 dot accumulator).
    """
    packed = []
    for w, b in params:
        eye = jnp.eye(pack, dtype=dtype)
        w_bd = jnp.kron(eye, w.astype(dtype))               # (pack*in, pack*out)
        b_rep = jnp.tile(b.astype(jnp.float32), (1, pack))  # (1, pack*out)
        packed.append((w_bd, b_rep))
    return packed


def mlp_reference(x, params):
    """Pure-JAX forward pass (also the XLA-fused small-batch path)."""
    h = x.astype(jnp.float32)
    for i, (w, b) in enumerate(params):
        h = h @ w + b
        if i < len(params) - 1:
            h = _selu(h)
    return h


def net_forward(x, params, *, pack=32, tm_packed=2048, min_pallas_rows=2048,
                out_dtype=None):
    """4-layer MLP forward pass as a single lane-dense batched Pallas kernel.

    params: list of (W_t, b_row) with W_t shape (in, out), b_row shape (1, out),
            float32 (PyTorch Linear weights pre-transposed).
    pack:   logical rows packed per lane-row (block-diagonal weight factor).
    tm_packed: packed-row tile per grid step (logical rows = pack * tm_packed).
    out_dtype: output stream dtype (defaults to x.dtype; bf16 is the roofline
            lever once memory-bound on v6e/v7x).
    """
    batch, n_feature = x.shape
    n_output = params[-1][0].shape[1]
    if out_dtype is None:
        out_dtype = x.dtype

    # Small or ragged batches: a standalone pallas_call is pure launch +
    # pipeline-prologue overhead at this size; let XLA fuse the MLP instead.
    if batch < min_pallas_rows or batch % pack != 0:
        return mlp_reference(x, params).astype(out_dtype)

    bp = batch // pack          # packed rows
    fp = pack * n_feature       # packed input lane width
    op = pack * n_output        # packed output lane width

    # Free row-major reshape (no data movement / extra HBM pass).
    x_packed = x.reshape(bp, fp)
    packed_params = pack_params(params, pack, dtype=x.dtype)

    # Packed-row tile: big (amortizes the ~0.35us/step pipeline overhead),
    # multiple of 8, capped for VMEM, and >= 2 grid steps when possible so
    # the "parallel" axis can shard across v7x's 2 TensorCores.
    tm_p = max(8, min(int(tm_packed), _MAX_TM_PACKED))
    tm_p = (tm_p // 8) * 8
    tm_p = min(tm_p, _round_up(bp, 8))
    if bp >= 16:
        tm_p = min(tm_p, _round_up(pl.cdiv(bp, 2), 8))
    grid = (pl.cdiv(bp, tm_p),)

    flat = [x_packed]
    in_specs = [pl.BlockSpec((tm_p, fp), lambda i: (i, 0))]
    # NOTE: the 4 weights / 4 biases could be concatenated into 1-2 resident
    # arrays to drop a few DMA descriptors; kept separate for clarity (minor).
    for w_bd, b_rep in packed_params:
        flat.append(w_bd)
        flat.append(b_rep)
        in_specs.append(pl.BlockSpec(w_bd.shape, lambda i: (0, 0)))  # resident
        in_specs.append(pl.BlockSpec(b_rep.shape, lambda i: (0, 0)))  # resident

    out_packed = pl.pallas_call(
        mlp_packed_kernel,
        out_shape=jax.ShapeDtypeStruct((bp, op), out_dtype),
        grid=grid,
        in_specs=in_specs,
        out_specs=pl.BlockSpec((tm_p, op), lambda i: (i, 0)),
        compiler_params=pltpu.CompilerParams(
            dimension_semantics=("parallel",)),
    )(*flat)

    # Free reshape back to the logical (batch, n_output) layout.
    return out_packed.reshape(batch, n_output)


def init_linear(key, in_features, out_features):
    """PyTorch-default-style init: U(-1/sqrt(fan_in), 1/sqrt(fan_in))."""
    kw, kb = jax.random.split(key)
    bound = 1.0 / jnp.sqrt(jnp.float32(in_features))
    # PyTorch stores weight as (out, in); build it that way, then transpose.
    w = jax.random.uniform(kw, (out_features, in_features), jnp.float32,
                           minval=-bound, maxval=bound)
    b = jax.random.uniform(kb, (out_features,), jnp.float32,
                           minval=-bound, maxval=bound)
    return w.T, b.reshape(1, out_features)


def make_net_params(key, n_feature, n_output):
    sizes = [(n_feature, 5), (5, 10), (10, 5), (5, n_output)]
    keys = jax.random.split(key, len(sizes))
    return [init_linear(k, fi, fo) for k, (fi, fo) in zip(keys, sizes)]


if __name__ == "__main__":
    key = jax.random.PRNGKey(0)
    k_x, k_p = jax.random.split(key)

    # Small feature/output dims per the module; batch large enough to take the
    # Pallas path with a 2-step lane-dense grid (2 tiles of 64 packed rows).
    batch, n_feature, n_output = 4096, 8, 4
    x = jax.random.normal(k_x, (batch, n_feature), jnp.float32)
    params = make_net_params(k_p, n_feature, n_output)

    ref = mlp_reference(x, params)

    # f32 path through the packed Pallas kernel.
    out = net_forward(x, params)
    jax.block_until_ready(out)
    assert out.shape == (batch, n_output)
    assert jnp.allclose(out, ref, atol=1e-4, rtol=1e-4), \
        float(jnp.max(jnp.abs(out - ref)))

    # bf16 stream contract: caller already stores x in bf16, wants bf16 out.
    # Accumulation, bias and SELU stay f32 inside the kernel.
    out_bf16 = net_forward(x.astype(jnp.bfloat16), params,
                           out_dtype=jnp.bfloat16)
    jax.block_until_ready(out_bf16)
    assert jnp.allclose(out_bf16.astype(jnp.float32), ref,
                        atol=1e-1, rtol=1e-1)

    # Small-batch dispatch: falls back to the XLA-fused path (no Pallas launch).
    out_small = net_forward(x[:100], params)
    jax.block_until_ready(out_small)
    assert jnp.allclose(out_small, ref[:100], atol=1e-5, rtol=1e-5)

    print("KERNEL_OK")
</pallas_src>

<mosaic_0001>
module attributes {stable_mosaic.version = 11 : i64} {
  func.func @mlp_packed_kernel(%arg0: i32, %arg1: memref<64x256xf32, #tpu.memory_space<vmem>>, %arg2: memref<256x160xf32, #tpu.memory_space<vmem>>, %arg3: memref<1x160xf32, #tpu.memory_space<vmem>>, %arg4: memref<160x320xf32, #tpu.memory_space<vmem>>, %arg5: memref<1x320xf32, #tpu.memory_space<vmem>>, %arg6: memref<320x160xf32, #tpu.memory_space<vmem>>, %arg7: memref<1x160xf32, #tpu.memory_space<vmem>>, %arg8: memref<160x128xf32, #tpu.memory_space<vmem>>, %arg9: memref<1x128xf32, #tpu.memory_space<vmem>>, %arg10: memref<64x128xf32, #tpu.memory_space<vmem>>) attributes {dimension_semantics = [#tpu.dimension_semantics<parallel>], iteration_bounds = array<i64: 2>, scalar_prefetch = 0 : i64, scratch_operands = 0 : i64, tpu.core_type = #tpu.core_type<tc>, window_params = [{transform_indices = @transform_0, window_bounds = array<i64: 64, 256>}, {pipeline_mode = #tpu.pipeline_mode<synchronous>, transform_indices = @transform_1, window_bounds = array<i64: 256, 160>}, {pipeline_mode = #tpu.pipeline_mode<synchronous>, transform_indices = @transform_2, window_bounds = array<i64: 1, 160>}, {pipeline_mode = #tpu.pipeline_mode<synchronous>, transform_indices = @transform_3, window_bounds = array<i64: 160, 320>}, {pipeline_mode = #tpu.pipeline_mode<synchronous>, transform_indices = @transform_4, window_bounds = array<i64: 1, 320>}, {pipeline_mode = #tpu.pipeline_mode<synchronous>, transform_indices = @transform_5, window_bounds = array<i64: 320, 160>}, {pipeline_mode = #tpu.pipeline_mode<synchronous>, transform_indices = @transform_6, window_bounds = array<i64: 1, 160>}, {pipeline_mode = #tpu.pipeline_mode<synchronous>, transform_indices = @transform_7, window_bounds = array<i64: 160, 128>}, {pipeline_mode = #tpu.pipeline_mode<synchronous>, transform_indices = @transform_8, window_bounds = array<i64: 1, 128>}, {transform_indices = @transform_9, window_bounds = array<i64: 64, 128>}]} {
    %c0 = arith.constant 0 : index
    %c0_0 = arith.constant 0 : index
    %0 = vector.load %arg1[%c0, %c0_0] : memref<64x256xf32, #tpu.memory_space<vmem>>, vector<64x256xf32>
    %c0_1 = arith.constant 0 : index
    %c0_2 = arith.constant 0 : index
    %1 = vector.load %arg2[%c0_1, %c0_2] : memref<256x160xf32, #tpu.memory_space<vmem>>, vector<256x160xf32>
    %cst = arith.constant dense<0.000000e+00> : vector<64x160xf32>
    %2 = tpu.matmul %0, %1, %cst {dimension_numbers = #tpu.dot_dimension_numbers<[1], [0], [0], [1], [0, 0, 1, 1], [], []>} : vector<64x256xf32>, vector<256x160xf32>, vector<64x160xf32> -> vector<64x160xf32>
    %c0_3 = arith.constant 0 : index
    %c0_4 = arith.constant 0 : index
    %3 = vector.load %arg3[%c0_3, %c0_4] : memref<1x160xf32, #tpu.memory_space<vmem>>, vector<1x160xf32>
    %4 = vector.broadcast %3 : vector<1x160xf32> to vector<64x160xf32>
    %5 = arith.addf %2, %4 : vector<64x160xf32>
    %cst_5 = arith.constant 0.000000e+00 : f32
    %6 = vector.broadcast %cst_5 : f32 to vector<64x160xf32>
    %7 = arith.cmpf ogt, %5, %6 : vector<64x160xf32>
    %cst_6 = arith.constant 0.000000e+00 : f32
    %8 = vector.broadcast %cst_6 : f32 to vector<64x160xf32>
    %9 = arith.minimumf %5, %8 : vector<64x160xf32>
    %10 = math.exp %9 : vector<64x160xf32>
    %cst_7 = arith.constant 1.000000e+00 : f32
    %11 = vector.broadcast %cst_7 : f32 to vector<64x160xf32>
    %12 = arith.subf %10, %11 : vector<64x160xf32>
    %cst_8 = arith.constant 1.67326319 : f32
    %13 = vector.broadcast %cst_8 : f32 to vector<64x160xf32>
    %14 = arith.mulf %13, %12 : vector<64x160xf32>
    %15 = arith.select %7, %5, %14 : vector<64x160xi1>, vector<64x160xf32>
    %cst_9 = arith.constant 1.05070102 : f32
    %16 = vector.broadcast %cst_9 : f32 to vector<64x160xf32>
    %17 = arith.mulf %16, %15 : vector<64x160xf32>
    %c0_10 = arith.constant 0 : index
    %c0_11 = arith.constant 0 : index
    %18 = vector.load %arg4[%c0_10, %c0_11] : memref<160x320xf32, #tpu.memory_space<vmem>>, vector<160x320xf32>
    %cst_12 = arith.constant dense<0.000000e+00> : vector<64x320xf32>
    %19 = tpu.matmul %17, %18, %cst_12 {dimension_numbers = #tpu.dot_dimension_numbers<[1], [0], [0], [1], [0, 0, 1, 1], [], []>} : vector<64x160xf32>, vector<160x320xf32>, vector<64x320xf32> -> vector<64x320xf32>
    %c0_13 = arith.constant 0 : index
    %c0_14 = arith.constant 0 : index
    %20 = vector.load %arg5[%c0_13, %c0_14] : memref<1x320xf32, #tpu.memory_space<vmem>>, vector<1x320xf32>
    %21 = vector.broadcast %20 : vector<1x320xf32> to vector<64x320xf32>
    %22 = arith.addf %19, %21 : vector<64x320xf32>
    %cst_15 = arith.constant 0.000000e+00 : f32
    %23 = vector.broadcast %cst_15 : f32 to vector<64x320xf32>
    %24 = arith.cmpf ogt, %22, %23 : vector<64x320xf32>
    %cst_16 = arith.constant 0.000000e+00 : f32
    %25 = vector.broadcast %cst_16 : f32 to vector<64x320xf32>
    %26 = arith.minimumf %22, %25 : vector<64x320xf32>
    %27 = math.exp %26 : vector<64x320xf32>
    %cst_17 = arith.constant 1.000000e+00 : f32
    %28 = vector.broadcast %cst_17 : f32 to vector<64x320xf32>
    %29 = arith.subf %27, %28 : vector<64x320xf32>
    %cst_18 = arith.constant 1.67326319 : f32
    %30 = vector.broadcast %cst_18 : f32 to vector<64x320xf32>
    %31 = arith.mulf %30, %29 : vector<64x320xf32>
    %32 = arith.select %24, %22, %31 : vector<64x320xi1>, vector<64x320xf32>
    %cst_19 = arith.constant 1.05070102 : f32
    %33 = vector.broadcast %cst_19 : f32 to vector<64x320xf32>
    %34 = arith.mulf %33, %32 : vector<64x320xf32>
    %c0_20 = arith.constant 0 : index
    %c0_21 = arith.constant 0 : index
    %35 = vector.load %arg6[%c0_20, %c0_21] : memref<320x160xf32, #tpu.memory_space<vmem>>, vector<320x160xf32>
    %cst_22 = arith.constant dense<0.000000e+00> : vector<64x160xf32>
    %36 = tpu.matmul %34, %35, %cst_22 {dimension_numbers = #tpu.dot_dimension_numbers<[1], [0], [0], [1], [0, 0, 1, 1], [], []>} : vector<64x320xf32>, vector<320x160xf32>, vector<64x160xf32> -> vector<64x160xf32>
    %c0_23 = arith.constant 0 : index
    %c0_24 = arith.constant 0 : index
    %37 = vector.load %arg7[%c0_23, %c0_24] : memref<1x160xf32, #tpu.memory_space<vmem>>, vector<1x160xf32>
    %38 = vector.broadcast %37 : vector<1x160xf32> to vector<64x160xf32>
    %39 = arith.addf %36, %38 : vector<64x160xf32>
    %cst_25 = arith.constant 0.000000e+00 : f32
    %40 = vector.broadcast %cst_25 : f32 to vector<64x160xf32>
    %41 = arith.cmpf ogt, %39, %40 : vector<64x160xf32>
    %cst_26 = arith.constant 0.000000e+00 : f32
    %42 = vector.broadcast %cst_26 : f32 to vector<64x160xf32>
    %43 = arith.minimumf %39, %42 : vector<64x160xf32>
    %44 = math.exp %43 : vector<64x160xf32>
    %cst_27 = arith.constant 1.000000e+00 : f32
    %45 = vector.broadcast %cst_27 : f32 to vector<64x160xf32>
    %46 = arith.subf %44, %45 : vector<64x160xf32>
    %cst_28 = arith.constant 1.67326319 : f32
    %47 = vector.broadcast %cst_28 : f32 to vector<64x160xf32>
    %48 = arith.mulf %47, %46 : vector<64x160xf32>
    %49 = arith.select %41, %39, %48 : vector<64x160xi1>, vector<64x160xf32>
    %cst_29 = arith.constant 1.05070102 : f32
    %50 = vector.broadcast %cst_29 : f32 to vector<64x160xf32>
    %51 = arith.mulf %50, %49 : vector<64x160xf32>
    %c0_30 = arith.constant 0 : index
    %c0_31 = arith.constant 0 : index
    %52 = vector.load %arg8[%c0_30, %c0_31] : memref<160x128xf32, #tpu.memory_space<vmem>>, vector<160x128xf32>
    %cst_32 = arith.constant dense<0.000000e+00> : vector<64x128xf32>
    %53 = tpu.matmul %51, %52, %cst_32 {dimension_numbers = #tpu.dot_dimension_numbers<[1], [0], [0], [1], [0, 0, 1, 1], [], []>} : vector<64x160xf32>, vector<160x128xf32>, vector<64x128xf32> -> vector<64x128xf32>
    %c0_33 = arith.constant 0 : index
    %c0_34 = arith.constant 0 : index
    %54 = vector.load %arg9[%c0_33, %c0_34] : memref<1x128xf32, #tpu.memory_space<vmem>>, vector<1x128xf32>
    %55 = vector.broadcast %54 : vector<1x128xf32> to vector<64x128xf32>
    %56 = arith.addf %53, %55 : vector<64x128xf32>
    %c0_35 = arith.constant 0 : index
    %c0_36 = arith.constant 0 : index
    %57 = vector.load %arg10[%c0_35, %c0_36] : memref<64x128xf32, #tpu.memory_space<vmem>>, vector<64x128xf32>
    tpu.vector_store %arg10[%c0_35, %c0_36], %56 {strides = array<i32>} : memref<64x128xf32, #tpu.memory_space<vmem>>, vector<64x128xf32>,
    return
  }
  func.func @transform_0(%arg0: i32) -> (i32, i32) {
    %c0_i32 = arith.constant 0 : i32
    %c0_i32_0 = arith.constant 0 : i32
    return %arg0, %c0_i32 : i32, i32
  }
  func.func @transform_1(%arg0: i32) -> (i32, i32) {
    %c0_i32 = arith.constant 0 : i32
    %c0_i32_0 = arith.constant 0 : i32
    %c0_i32_1 = arith.constant 0 : i32
    return %c0_i32, %c0_i32_0 : i32, i32
  }
  func.func @transform_2(%arg0: i32) -> (i32, i32) {
    %c0_i32 = arith.constant 0 : i32
    %c0_i32_0 = arith.constant 0 : i32
    %c0_i32_1 = arith.constant 0 : i32
    return %c0_i32, %c0_i32_0 : i32, i32
  }
  func.func @transform_3(%arg0: i32) -> (i32, i32) {
    %c0_i32 = arith.constant 0 : i32
    %c0_i32_0 = arith.constant 0 : i32
    %c0_i32_1 = arith.constant 0 : i32
    return %c0_i32, %c0_i32_0 : i32, i32
  }
  func.func @transform_4(%arg0: i32) -> (i32, i32) {
    %c0_i32 = arith.constant 0 : i32
    %c0_i32_0 = arith.constant 0 : i32
    %c0_i32_1 = arith.constant 0 : i32
    return %c0_i32, %c0_i32_0 : i32, i32
  }
  func.func @transform_5(%arg0: i32) -> (i32, i32) {
    %c0_i32 = arith.constant 0 : i32
    %c0_i32_0 = arith.constant 0 : i32
    %c0_i32_1 = arith.constant 0 : i32
    return %c0_i32, %c0_i32_0 : i32, i32
  }
  func.func @transform_6(%arg0: i32) -> (i32, i32) {
    %c0_i32 = arith.constant 0 : i32
    %c0_i32_0 = arith.constant 0 : i32
    %c0_i32_1 = arith.constant 0 : i32
    return %c0_i32, %c0_i32_0 : i32, i32
  }
  func.func @transform_7(%arg0: i32) -> (i32, i32) {
    %c0_i32 = arith.constant 0 : i32
    %c0_i32_0 = arith.constant 0 : i32
    %c0_i32_1 = arith.constant 0 : i32
    return %c0_i32, %c0_i32_0 : i32, i32
  }
  func.func @transform_8(%arg0: i32) -> (i32, i32) {
    %c0_i32 = arith.constant 0 : i32
    %c0_i32_0 = arith.constant 0 : i32
    %c0_i32_1 = arith.constant 0 : i32
    return %c0_i32, %c0_i32_0 : i32, i32
  }
  func.func @transform_9(%arg0: i32) -> (i32, i32) {
    %c0_i32 = arith.constant 0 : i32
    %c0_i32_0 = arith.constant 0 : i32
    return %arg0, %c0_i32 : i32, i32
  }
}

</mosaic_0001>

<bundles_post_ra>
// kernel: tpu_custom_call.1
= control target key start
LH: loop header
LB: loop body
LE: loop exit
PB: predicated region body
PF: predicated region fallthrough
CT: control target
= control target key end

     0   :  { %s3885_s0 = inlined_call_operand.vmem [shape: f32[128,256], index: 0, kind: input, shape index: {}]   ;;  %s3886_s1 = inlined_call_operand.vmem [shape: f32[256,160], index: 1, kind: input, shape index: {}]   ;;  %s3887_s2 = inlined_call_operand.vmem [shape: f32[1,160], index: 2, kind: input, shape index: {}]   ;;  %s3888_s3 = inlined_call_operand.vmem [shape: f32[160,320], index: 3, kind: input, shape index: {}]   ;;  %s3889_s4 = inlined_call_operand.vmem [shape: f32[1,320], index: 4, kind: input, shape index: {}]   ;;  %s3890_s5 = inlined_call_operand.vmem [shape: f32[320,160], index: 5, kind: input, shape index: {}]   ;;  %s3891_s6 = inlined_call_operand.vmem [shape: f32[1,160], index: 6, kind: input, shape index: {}]   ;;  %s3892_s7 = inlined_call_operand.vmem [shape: f32[160,128], index: 7, kind: input, shape index: {}]   ;;  %s3893_s8 = inlined_call_operand.vmem [shape: f32[1,128], index: 8, kind: input, shape index: {}]   ;;  %s3894_s9 = inlined_call_operand.hbm [shape: f32[128,128], index: 9, kind: output, shape index: {}]  }
   0x1   :  { %3895 = sst [smem:[#allocation5_spill]] %s3885_s0 }
   0x2   :  { %14 = vsyncpa [#allocation3], 0 }
   0x3   :  { %16 = vsyncpa [#allocation3 + $0x1], 0  ;;  %s2567_s30 = smov 0   ;;  %s2569_s10 = smov 0  }
   0x4   :  { %s2571_s11 = smov 0   ;;  %s2573_s12 = smov 0  }
   0x5 LB: > { %s2588_s13 = sadd.s32 4294967295, %s2510_s12   ;;  %s1893_s14 = sadd.s32 4294967294, %s2510_s12   ;;  %s2510_s12 = sphi %s2573_s12, %s3902_s12   ;;  %s2506_s11 = sphi %s2571_s11, %s3901_s11   ;;  %s2502_s10 = sphi %s2569_s10, %s3900_s10   ;;  %s2498_s30 = sphi %s2567_s30, %s3899_s30  }
   0x6   : > { %s2592_s15 = sadd.s32 1, %s2510_s12   ;;  %s223_s16 = sadd.s32 1, %s2506_s11 }
   0x7   : > { %s220_s17 = ssub.s32 %s2510_s12, %s2592_s15  ;;  %p233_p0 = scmp.ne.s32.totalorder %s2506_s11, %s2502_s10 }
   0x8   : > { %p221_p1 = scmp.eq.s32.totalorder %s220_s17, 0  ;;  %p234_p2 = scmp.eq.s32.totalorder %s2588_s13, 1 }
   0x9   : > { %p239_p3 = scmp.ne.s32.totalorder %s2502_s10, %s2498_s30  ;;  %p240_p4 = scmp.eq.s32.totalorder %s1893_s14, 1 }
   0xa   : > { %s2603_s18 = scalar_select %p221_p1, %s2506_s11, %s223_s16  }
   0xb   : > { %p2605_p5 = por %p234_p2, %p233_p0  ;;  %p2609_p6 = por %p240_p4, %p239_p3 }
   0xc   : > { %p1896_p7 = scmp.ge.s32.totalorder %s2510_s12, 1  ;;  %p292_p8 = scmp.lt.s32.totalorder %s2510_s12, 3 }
   0xe   : > { %p293_p9 = pnand %p1896_p7, %p292_p8 }
   0xf   : > { %v354_v0 = vld [vmem:[%s3886_s1 + $0x8] sm:$0xff] (!%p293_p9)  ;;  %v356_v1 = vld [vmem:[%s3886_s1 + $0x18] sm:$0xff] (!%p293_p9)  ;;  %v353_v2 = vld [vmem:[%s3886_s1] sm:$0xff] (!%p293_p9)  ;;  %s1898_s29 = sshll.u32 (!%p293_p9), %s2588_s13, 3  ;;  %s3898_s0 = sld [smem:[#allocation5_spill]] (!%p293_p9)  ;;  %vm747_vm0 = vcmask (!%p293_p9), 261120  }
  0x10   : > { %296 = sbr.rel (%p293_p9) target bundleno = 1092 (0x444), region = 56  ;;  %v1997_v3 = vpack.c.bf16 (!%p293_p9), %v356_v1, %v354_v0  ;;  %v355_v4 = vld [vmem:[%s3886_s1 + $0x10] sm:$0xff] (!%p293_p9)  ;;  %v358_v5 = vld [vmem:[%s3886_s1 + $0x28] sm:$0xff] (!%p293_p9)  ;;  %v360_v6 = vld [vmem:[%s3886_s1 + $0x38] sm:$0xff] (!%p293_p9)  ;;  %p330_p10 = scmp.lt.s32.totalorder (!%p293_p9), %s1898_s29, 15 }
  0x11   : > { %v1999_v7 = vpack.c.bf16 (!%p293_p9), %v355_v4, %v353_v2  ;;  %v2001_v8 = vpack.c.bf16 (!%p293_p9), %v360_v6, %v358_v5  ;;  %v357_v9 = vld [vmem:[%s3886_s1 + $0x20] sm:$0xff] (!%p293_p9)  ;;  %v359_v10 = vld [vmem:[%s3886_s1 + $0x30] sm:$0xff] (!%p293_p9)  ;;  %v362_v11 = vld [vmem:[%s3886_s1 + $0x48] sm:$0xff] (!%p293_p9)  ;;  %s1996_s22 = sshll.u32 (!%p293_p9), %s2588_s13, 10 }
  0x12   : > { %1998 = vmatprep.subr.bf16.mxu0 (!%p293_p9), %v1997_v3  ;;  %v364_v12 = vld [vmem:[%s3886_s1 + $0x58] sm:$0xff] (!%p293_p9)  ;;  %v2003_v13 = vpack.c.bf16 (!%p293_p9), %v359_v10, %v357_v9  ;;  %v361_v15 = vld [vmem:[%s3886_s1 + $0x40] sm:$0xff] (!%p293_p9)  ;;  %v363_v16 = vld [vmem:[%s3886_s1 + $0x50] sm:$0xff] (!%p293_p9) }
  0x13   : > { %2000 = vmatpush1.bf16.msra.mxu0 (!%p293_p9), %v1999_v7  ;;  %v2005_v14 = vpack.c.bf16 (!%p293_p9), %v364_v12, %v362_v11  ;;  %v366_v17 = vld [vmem:[%s3886_s1 + $0x68] sm:$0xff] (!%p293_p9)  ;;  %v368_v18 = vld [vmem:[%s3886_s1 + $0x78] sm:$0xff] (!%p293_p9)  ;;  %v2007_v19 = vpack.c.bf16 (!%p293_p9), %v363_v16, %v361_v15  ;;  %v365_v21 = vld [vmem:[%s3886_s1 + $0x60] sm:$0xff] (!%p293_p9) }
  0x14   : > { %2002 = vmatprep.subr.bf16.mxu0 (!%p293_p9), %v2001_v8  ;;  %v2009_v20 = vpack.c.bf16 (!%p293_p9), %v368_v18, %v366_v17  ;;  %v367_v22 = vld [vmem:[%s3886_s1 + $0x70] sm:$0xff] (!%p293_p9)  ;;  %v370_v23 = vld [vmem:[%s3886_s1 + $0x88] sm:$0xff] (!%p293_p9)  ;;  %v372_v24 = vld [vmem:[%s3886_s1 + $0x98] sm:$0xff] (!%p293_p9) }
  0x15   : > { %v2011_v25 = vpack.c.bf16 (!%p293_p9), %v367_v22, %v365_v21  ;;  %v2013_v26 = vpack.c.bf16 (!%p293_p9), %v372_v24, %v370_v23  ;;  %v369_v27 = vld [vmem:[%s3886_s1 + $0x80] sm:$0xff] (!%p293_p9)  ;;  %v371_v28 = vld [vmem:[%s3886_s1 + $0x90] sm:$0xff] (!%p293_p9)  ;;  %v374_v29 = vld [vmem:[%s3886_s1 + $0xa8] sm:$0xff] (!%p293_p9) }
  0x16   : > { %v376_v30 = vld [vmem:[%s3886_s1 + $0xb8] sm:$0xff] (!%p293_p9)  ;;  %v2015_v31 = vpack.c.bf16 (!%p293_p9), %v371_v28, %v369_v27  ;;  %v373_v33 = vld [vmem:[%s3886_s1 + $0xa0] sm:$0xff] (!%p293_p9)  ;;  %v375_v34 = vld [vmem:[%s3886_s1 + $0xb0] sm:$0xff] (!%p293_p9) }
  0x17   : > { %2004 = vmatpush1.bf16.msra.mxu0 %v2003_v13  ;;  %s3904_s29 = smov (!%p330_p10, %s1898_s29), 15  ;;  %v2017_v32 = vpack.c.bf16 %v376_v30, %v374_v29  ;;  %v378_v35 = vld [vmem:[%s3886_s1 + $0xc8] sm:$0xff]  ;;  %v380_v36 = vld [vmem:[%s3886_s1 + $0xd8] sm:$0xff]  ;;  %v2019_v37 = vpack.c.bf16 %v375_v34, %v373_v33  ;;  %v377_v39 = vld [vmem:[%s3886_s1 + $0xc0] sm:$0xff] }
  0x18   : > { %2006 = vmatprep.subr.bf16.mxu0 %v2005_v14  ;;  %s1995_s17 = sshll.u32 %s3904_s29, 4  ;;  %v2021_v38 = vpack.c.bf16 %v380_v36, %v378_v35  ;;  %v379_v40 = vld [vmem:[%s3886_s1 + $0xd0] sm:$0xff]  ;;  %v382_v42 = vld [vmem:[%s3886_s1 + $0xe8] sm:$0xff]  ;;  %v384_v43 = vld [vmem:[%s3886_s1 + $0xf8] sm:$0xff] }
  0x19   : > { %s2697_s16 = scalar_lea.vmem %s3898_s0, %s1995_s17  ;;  %v2023_v44 = vpack.c.bf16 %v379_v40, %v377_v39  ;;  %v2025_v45 = vpack.c.bf16 %v384_v43, %v382_v42  ;;  %v381_v46 = vld [vmem:[%s3886_s1 + $0xe0] sm:$0xff]  ;;  %v383_v47 = vld [vmem:[%s3886_s1 + $0xf0] sm:$0xff]  ;;  %v386_v48 = vld [vmem:[%s3886_s1 + $0x108] sm:$0xff]  ;;  %s3837_s0 = scalar_lea.hbm %s3894_s9, %s1996_s22 }
  0x1a   : > { %v338_v41 = vld [vmem:[%s2697_s16 + $0x8] sm:$0xff]  ;;  %v388_v49 = vld [vmem:[%s3886_s1 + $0x118] sm:$0xff]  ;;  %v385_v51 = vld [vmem:[%s3886_s1 + $0x100] sm:$0xff]  ;;  %v2027_v56 = vpack.c.bf16 %v383_v47, %v381_v46  ;;  %s2514_s17 = smov [#allocation2]  }
  0x1b   : > { %2008 = vmatpush1.bf16.msra.mxu0 %v2007_v19  ;;  %493 = vmatprep.mubr.f32.mxu0 %v338_v41  ;;  %v671_v50 = vld [vmem:[%s3888_s3 + $0x8] sm:$0xff]  ;;  %v387_v52 = vld [vmem:[%s3886_s1 + $0x110] sm:$0xff]  ;;  %v674_v53 = vld [vmem:[%s3888_s3 + $0x20] sm:$0xff]  ;;  %v2029_v62 = vpack.c.bf16 %v388_v49, %v386_v48  ;;  %s2452_s27 = sshll.u32 %s2514_s17, 4  ;;  %s2453_s27 = int_to_ptr.vmem [resolvable:$false] %s2452_s27 }
  0x1c   : > { %2010 = vmatprep.subr.bf16.mxu0 %v2009_v20  ;;  %v670_v54 = vld [vmem:[%s3888_s3] sm:$0xff]  ;;  %v673_v55 = vld [vmem:[%s3888_s3 + $0x18] sm:$0xff]  ;;  %v2061_v57 = vpack.c.bf16 %v674_v53, %v671_v50  ;;  %v680_v60 = vld [vmem:[%s3888_s3 + $0x50] sm:$0xff]  ;;  %v2031_v6 = vpack.c.bf16 %v387_v52, %v385_v51 }
  0x1d   : > { %v2063_v58 = vpack.c.bf16 %v673_v55, %v670_v54  ;;  %v677_v59 = vld [vmem:[%s3888_s3 + $0x38] sm:$0xff]  ;;  %v676_v61 = vld [vmem:[%s3888_s3 + $0x30] sm:$0xff]  ;;  %v679_v0 = vld [vmem:[%s3888_s3 + $0x48] sm:$0xff] }
  0x1e   : > { %v2065_v63 = vpack.c.bf16 %v680_v60, %v677_v59  ;;  %v683_v1 = vld [vmem:[%s3888_s3 + $0x68] sm:$0xff]  ;;  %v686_v2 = vld [vmem:[%s3888_s3 + $0x80] sm:$0xff]  ;;  %v392_v4 = vld [vmem:[%s3886_s1 + $0x138] sm:$0xff]  ;;  %2062 = vmatprep.subr.bf16.mxu1 %v2061_v57  ;;  %v2067_v5 = vpack.c.bf16 %v679_v0, %v676_v61 }
  0x1f   : > { %2012 = vmatpush1.bf16.msra.mxu0 %v2011_v25  ;;  %v390_v3 = vld [vmem:[%s3886_s1 + $0x128] sm:$0xff]  ;;  %2064 = vmatpush1.bf16.msra.mxu1 %v2063_v58  ;;  %v389_v7 = vld [vmem:[%s3886_s1 + $0x120] sm:$0xff]  ;;  %v2069_v8 = vpack.c.bf16 %v686_v2, %v683_v1  ;;  %v685_v10 = vld [vmem:[%s3888_s3 + $0x78] sm:$0xff] }
  0x20   : > { %2014 = vmatprep.subr.bf16.mxu0 %v2013_v26  ;;  %2066 = vmatprep.subr.bf16.mxu1 %v2065_v63  ;;  %v682_v9 = vld [vmem:[%s3888_s3 + $0x60] sm:$0xff]  ;;  %v2033_v11 = vpack.c.bf16 %v392_v4, %v390_v3  ;;  %v391_v12 = vld [vmem:[%s3886_s1 + $0x130] sm:$0xff]  ;;  %v689_v13 = vld [vmem:[%s3888_s3 + $0x98] sm:$0xff] }
  0x21   : > { %v692_v14 = vld [vmem:[%s3888_s3 + $0xb0] sm:$0xff]  ;;  %v394_v15 = vld [vmem:[%s3886_s1 + $0x148] sm:$0xff]  ;;  %v396_v16 = vld [vmem:[%s3886_s1 + $0x158] sm:$0xff]  ;;  %v2071_v17 = vpack.c.bf16 %v685_v10, %v682_v9  ;;  %v2035_v18 = vpack.c.bf16 %v391_v12, %v389_v7 }
  0x22   : > { %v2073_v19 = vpack.c.bf16 %v692_v14, %v689_v13  ;;  %v688_v20 = vld [vmem:[%s3888_s3 + $0x90] sm:$0xff]  ;;  %v691_v21 = vld [vmem:[%s3888_s3 + $0xa8] sm:$0xff]  ;;  %v2037_v22 = vpack.c.bf16 %v396_v16, %v394_v15  ;;  %v393_v23 = vld [vmem:[%s3886_s1 + $0x140] sm:$0xff] }
  0x23   : > { %2016 = vmatpush1.bf16.msra.mxu0 %v2015_v31  ;;  %2068 = vmatpush1.bf16.msra.mxu1 %v2067_v5  ;;  %v395_v24 = vld [vmem:[%s3886_s1 + $0x150] sm:$0xff]  ;;  %v398_v25 = vld [vmem:[%s3886_s1 + $0x168] sm:$0xff]  ;;  %v400_v26 = vld [vmem:[%s3886_s1 + $0x178] sm:$0xff]  ;;  %v2075_v27 = vpack.c.bf16 %v691_v21, %v688_v20 }
  0x24   : > { %2018 = vmatprep.subr.bf16.mxu0 %v2017_v32  ;;  %2070 = vmatprep.subr.bf16.mxu1 %v2069_v8  ;;  %v2039_v28 = vpack.c.bf16 %v395_v24, %v393_v23  ;;  %v2041_v29 = vpack.c.bf16 %v400_v26, %v398_v25  ;;  %v397_v30 = vld [vmem:[%s3886_s1 + $0x160] sm:$0xff]  ;;  %v399_v31 = vld [vmem:[%s3886_s1 + $0x170] sm:$0xff]  ;;  %v402_v32 = vld [vmem:[%s3886_s1 + $0x188] sm:$0xff] }
  0x25   : > { %v404_v33 = vld [vmem:[%s3886_s1 + $0x198] sm:$0xff]  ;;  %v2043_v34 = vpack.c.bf16 %v399_v31, %v397_v30  ;;  %v401_v36 = vld [vmem:[%s3886_s1 + $0x180] sm:$0xff]  ;;  %v407_v43 = vld [vmem:[%s3886_s1 + $0x1b0] sm:$0xff] }
  0x26   : > { %v2045_v35 = vpack.c.bf16 %v404_v33, %v402_v32  ;;  %v408_v39 = vld [vmem:[%s3886_s1 + $0x1b8] sm:$0xff]  ;;  %v405_v42 = vld [vmem:[%s3886_s1 + $0x1a0] sm:$0xff]  ;;  %v411_v49 = vld [vmem:[%s3886_s1 + $0x1d0] sm:$0xff] }
  0x27   : > { %2020 = vmatpush1.bf16.msra.mxu0 %v2019_v37  ;;  %2072 = vmatpush1.bf16.msra.mxu1 %v2071_v17  ;;  %v403_v37 = vld [vmem:[%s3886_s1 + $0x190] sm:$0xff]  ;;  %v2051_v46 = vpack.c.bf16 %v407_v43, %v405_v42  ;;  %v409_v48 = vld [vmem:[%s3886_s1 + $0x1c0] sm:$0xff]  ;;  %v414_v50 = vld [vmem:[%s3886_s1 + $0x1e8] sm:$0xff] }
  0x28   : > { %2022 = vmatprep.subr.bf16.mxu0 %v2021_v38  ;;  %2074 = vmatprep.subr.bf16.mxu1 %v2073_v19  ;;  %v406_v38 = vld [vmem:[%s3886_s1 + $0x1a8] sm:$0xff]  ;;  %v2047_v40 = vpack.c.bf16 %v403_v37, %v401_v36  ;;  %v416_v51 = vld [vmem:[%s3886_s1 + $0x1f8] sm:$0xff]  ;;  %v2055_v52 = vpack.c.bf16 %v411_v49, %v409_v48  ;;  %v413_v54 = vld [vmem:[%s3886_s1 + $0x1e0] sm:$0xff] }
  0x29   : > { %v2049_v41 = vpack.c.bf16 %v408_v39, %v406_v38  ;;  %v2057_v53 = vpack.c.bf16 %v416_v51, %v414_v50  ;;  %v415_v55 = vld [vmem:[%s3886_s1 + $0x1f0] sm:$0xff]  ;;  %v337_v57 = vld [vmem:[%s2697_s16] sm:$0xff]  ;;  %v340_v58 = vld [vmem:[%s2697_s16 + $0x18] sm:$0xff] }
  0x2a   : > { %v339_v59 = vld [vmem:[%s2697_s16 + $0x10] sm:$0xff]  ;;  %v342_v60 = vld [vmem:[%s2697_s16 + $0x28] sm:$0xff]  ;;  %v341_v61 = vld [vmem:[%s2697_s16 + $0x20] sm:$0xff] }
  0x2b   : > { %2024 = vmatpush1.bf16.msra.mxu0 %v2023_v44  ;;  %2076 = vmatpush1.bf16.msra.mxu1 %v2075_v27  ;;  %v410_v44 = vld [vmem:[%s3886_s1 + $0x1c8] sm:$0xff]  ;;  %v343_v63 = vld [vmem:[%s2697_s16 + $0x30] sm:$0xff]  ;;  %v345_v1 = vld [vmem:[%s2697_s16 + $0x40] sm:$0xff] }
  0x2c   : > { %2026 = vmatprep.subr.bf16.mxu0 %v2025_v45  ;;  %v412_v45 = vld [vmem:[%s3886_s1 + $0x1d8] sm:$0xff]  ;;  %v346_v0 = vld [vmem:[%s2697_s16 + $0x48] sm:$0xff]  ;;  %v347_v3 = vld [vmem:[%s2697_s16 + $0x50] sm:$0xff] }
  0x2d   : > { %v2053_v47 = vpack.c.bf16 %v412_v45, %v410_v44  ;;  %v348_v2 = vld [vmem:[%s2697_s16 + $0x58] sm:$0xff]  ;;  %v350_v4 = vld [vmem:[%s2697_s16 + $0x68] sm:$0xff]  ;;  %v349_v5 = vld [vmem:[%s2697_s16 + $0x60] sm:$0xff]  ;;  %v2512_v44 = vmov 0.0|0.0  }
  0x2e   : > { %v351_v7 = vld [vmem:[%s2697_s16 + $0x70] sm:$0xff]  ;;  %v695_v8 = vld [vmem:[%s3888_s3 + $0xc8] sm:$0xff]  ;;  %v698_v9 = vld [vmem:[%s3888_s3 + $0xe0] sm:$0xff] }
  0x2f   : > { %2028 = vmatpush1.bf16.msra.mxu0 %v2027_v56  ;;  %v2059_v56 = vpack.c.bf16 %v415_v55, %v413_v54  ;;  %v2077_v10 = vpack.c.bf16 %v698_v9, %v695_v8  ;;  %v697_v12 = vld [vmem:[%s3888_s3 + $0xd8] sm:$0xff]  ;;  %v704_v15 = vld [vmem:[%s3888_s3 + $0x110] sm:$0xff]  ;;  %v707_v20 = vld [vmem:[%s3888_s3 + $0x128] sm:$0xff] }
  0x30   : > { %2030 = vmatprep.subr.bf16.mxu0 %v2029_v62  ;;  %v344_v62 = vld [vmem:[%s2697_s16 + $0x38] sm:$0xff]  ;;  %v700_v17 = vld [vmem:[%s3888_s3 + $0xf0] sm:$0xff]  ;;  %v710_v21 = vld [vmem:[%s3888_s3 + $0x140] sm:$0xff] }
  0x31   : > { %2078 = vmatprep.subr.bf16.mxu1 %v2077_v10  ;;  %v701_v14 = vld [vmem:[%s3888_s3 + $0xf8] sm:$0xff]  ;;  %v706_v23 = vld [vmem:[%s3888_s3 + $0x120] sm:$0xff]  ;;  %v716_v27 = vld [vmem:[%s3888_s3 + $0x170] sm:$0xff] }
  0x32   : > { %v2081_v16 = vpack.c.bf16 %v704_v15, %v701_v14  ;;  %v709_v24 = vld [vmem:[%s3888_s3 + $0x138] sm:$0xff]  ;;  %v715_v30 = vld [vmem:[%s3888_s3 + $0x168] sm:$0xff]  ;;  %v722_v33 = vld [vmem:[%s3888_s3 + $0x1a0] sm:$0xff] }
  0x33   : > { %2032 = vmatpush1.bf16.msra.mxu0 %v2031_v6  ;;  %v352_v6 = vld [vmem:[%s2697_s16 + $0x78] sm:$0xff]  ;;  %v2087_v25 = vpack.c.bf16 %v709_v24, %v706_v23  ;;  %v719_v32 = vld [vmem:[%s3888_s3 + $0x188] sm:$0xff]  ;;  %v728_v39 = vld [vmem:[%s3888_s3 + $0x1d0] sm:$0xff]  ;;  %s326_s16 = sand.u32 1, %s2502_s10  }
  0x34   : > { %2034 = vmatprep.subr.bf16.mxu0 %v2033_v11  ;;  %v694_v11 = vld [vmem:[%s3888_s3 + $0xc0] sm:$0xff]  ;;  %v713_v26 = vld [vmem:[%s3888_s3 + $0x158] sm:$0xff]  ;;  %v727_v42 = vld [vmem:[%s3888_s3 + $0x1c8] sm:$0xff]  ;;  %s1897_s28 = sshll.u32 %s326_s16, 6  ;;  %s3844_s26 = scalar_lea.sflag [#allocation3], %s326_s16 }
  0x35   : > { %v2079_v13 = vpack.c.bf16 %v697_v12, %v694_v11  ;;  %v721_v36 = vld [vmem:[%s3888_s3 + $0x198] sm:$0xff]  ;;  %v1183_v45 = vld [vmem:[%s3890_s5 + $0x8] sm:$0xff]  ;;  %v1184_v49 = vld [vmem:[%s3890_s5 + $0x10] sm:$0xff]  ;;  %s3823_s21 = scalar_lea.vmem [#allocation2], %s1897_s28  ;;  %s2454_s28 = scalar_lea.vmem %s2453_s27, 2048 }
  0x36   : > { %v725_v38 = vld [vmem:[%s3888_s3 + $0x1b8] sm:$0xff]  ;;  %v1187_v50 = vld [vmem:[%s3890_s5 + $0x28] sm:$0xff]  ;;  %v1186_v54 = vld [vmem:[%s3890_s5 + $0x20] sm:$0xff]  ;;  %s1831_s23 = sshll.u32 %s3823_s21, 4  ;;  %s3839_s23 = int_to_ptr.vmem [resolvable:$true] %s1831_s23 }
  0x37   : > { %2036 = vmatpush1.bf16.msra.mxu0 %v2035_v18  ;;  %2080 = vmatpush1.bf16.msra.mxu1 %v2079_v13  ;;  %v703_v18 = vld [vmem:[%s3888_s3 + $0x108] sm:$0xff]  ;;  %v1189_v51 = vld [vmem:[%s3890_s5 + $0x38] sm:$0xff]  ;;  %v1188_v55 = vld [vmem:[%s3890_s5 + $0x30] sm:$0xff]  ;;  %s2448_s13 = scalar_lea.vmem %s3839_s23, 1024  ;;  %p2455_p0 = scmp.lt.s32.totalorder %s3839_s23, %s2453_s27 }
  0x38   : > { %2038 = vmatprep.subr.bf16.mxu0 %v2037_v22  ;;  %v2083_v19 = vpack.c.bf16 %v703_v18, %v700_v17  ;;  %2082 = vmatprep.subr.bf16.mxu1 %v2081_v16  ;;  %v2085_v22 = vpack.c.bf16 %v710_v21, %v707_v20  ;;  %v1198_v9 = vld [vmem:[%s3890_s5 + $0x80] sm:$0xff]  ;;  %v1200_v10 = vld [vmem:[%s3890_s5 + $0x90] sm:$0xff]  ;;  %v1203_v11 = vld [vmem:[%s3890_s5 + $0xa8] sm:$0xff]  ;;  %p2449_p11 = scmp.ne.s32.totalorder %s3839_s23, %s2448_s13  ;;  %p2456_p1 = scmp.lt.s32.totalorder %s2454_s28, %s2448_s13 }
  0x39   : > { %v1205_v12 = vld [vmem:[%s3890_s5 + $0xb8] sm:$0xff]  ;;  %v2149_v13 = vpack.c.bf16 %v1200_v10, %v1198_v9  ;;  %v1202_v16 = vld [vmem:[%s3890_s5 + $0xa0] sm:$0xff]  ;;  %v1204_v17 = vld [vmem:[%s3890_s5 + $0xb0] sm:$0xff] }
  0x3a   : > { %v2151_v15 = vpack.c.bf16 %v1205_v12, %v1203_v11  ;;  %v1207_v18 = vld [vmem:[%s3890_s5 + $0xc8] sm:$0xff]  ;;  %v2153_v20 = vpack.c.bf16 %v1204_v17, %v1202_v16  ;;  %v1206_v23 = vld [vmem:[%s3890_s5 + $0xc0] sm:$0xff]  ;;  %v1208_v24 = vld [vmem:[%s3890_s5 + $0xd0] sm:$0xff]  ;;  %p2450_p12 = pnand %p2449_p11, %p2605_p5  ;;  %p2457_p2 = por %p2456_p1, %p2455_p0 }
  0x3b   : > { %2040 = vmatpush1.bf16.msra.mxu0 %v2039_v28  ;;  %2084 = vmatpush1.bf16.msra.mxu1 %v2083_v19  ;;  %v2089_v28 = vpack.c.bf16 %v716_v27, %v713_v26  ;;  %v1209_v19 = vld [vmem:[%s3890_s5 + $0xd8] sm:$0xff]  ;;  %v1211_v27 = vld [vmem:[%s3890_s5 + $0xe8] sm:$0xff] }
  0x3c   : > { %2042 = vmatprep.subr.bf16.mxu0 %v2041_v29  ;;  %2086 = vmatprep.subr.bf16.mxu1 %v2085_v22  ;;  %v712_v29 = vld [vmem:[%s3888_s3 + $0x150] sm:$0xff]  ;;  %v2155_v22 = vpack.c.bf16 %v1209_v19, %v1207_v18  ;;  %p2451_p13 = pneg %p2450_p12 }
  0x3d   : > { %v2091_v31 = vpack.c.bf16 %v715_v30, %v712_v29  ;;  %v2157_v29 = vpack.c.bf16 %v1208_v24, %v1206_v23  ;;  %v3122_v23 = vld [vmem:[%s3888_s3 + $0x10] sm:$0xff]  ;;  %v3127_v24 = vld [vmem:[%s3888_s3 + $0x28] sm:$0xff] }
  0x3e   : > { %p2458_p3 = pnand %p2457_p2, %p2451_p13 }
  0x3f   : > { %2044 = vmatpush1.bf16.msra.mxu0 %v2043_v34  ;;  %2088 = vmatpush1.bf16.msra.mxu1 %v2087_v25  ;;  %v2093_v34 = vpack.c.bf16 %v722_v33, %v719_v32  ;;  %v417_v25 = vld [vmem:[%s3887_s2] sm:$0x3]  ;;  %v1212_v33 = vld [vmem:[%s3890_s5 + $0xf0] sm:$0xff] }
  0x40   : > { %2046 = vmatprep.subr.bf16.mxu0 %v2045_v35  ;;  %2090 = vmatprep.subr.bf16.mxu1 %v2089_v28  ;;  %v718_v35 = vld [vmem:[%s3888_s3 + $0x180] sm:$0xff]  ;;  %v1213_v28 = vld [vmem:[%s3890_s5 + $0xf8] sm:$0xff] }
  0x41   : > { %v2095_v37 = vpack.c.bf16 %v721_v36, %v718_v35  ;;  %v1210_v32 = vld [vmem:[%s3890_s5 + $0xe0] sm:$0xff]  ;;  %v1215_v35 = vld [vmem:[%s3890_s5 + $0x108] sm:$0xff]  ;;  %v1217_v36 = vld [vmem:[%s3890_s5 + $0x118] sm:$0xff] }
  0x43   : > { %2048 = vmatpush1.bf16.msra.mxu0 %v2047_v40  ;;  %2092 = vmatpush1.bf16.msra.mxu1 %v2091_v31  ;;  %v2097_v40 = vpack.c.bf16 %v728_v39, %v725_v38  ;;  %v2159_v31 = vpack.c.bf16 %v1213_v28, %v1211_v27  ;;  %v2161_v38 = vpack.c.bf16 %v1212_v33, %v1210_v32 }
  0x44   : > { %2050 = vmatprep.subr.bf16.mxu0 %v2049_v41  ;;  %2094 = vmatprep.subr.bf16.mxu1 %v2093_v34  ;;  %v724_v41 = vld [vmem:[%s3888_s3 + $0x1b0] sm:$0xff] }
  0x45   : > { %v2099_v43 = vpack.c.bf16 %v727_v42, %v724_v41  ;;  %v2163_v41 = vpack.c.bf16 %v1217_v36, %v1215_v35  ;;  %v1214_v42 = vld [vmem:[%s3890_s5 + $0x100] sm:$0xff] }
  0x47   : > { %2052 = vmatpush1.bf16.msra.mxu0 %v2051_v46  ;;  %2096 = vmatpush1.bf16.msra.mxu1 %v2095_v37  ;;  %v1185_v46 = vld [vmem:[%s3890_s5 + $0x18] sm:$0xff] }
  0x48   : > { %2054 = vmatprep.subr.bf16.mxu0 %v2053_v47  ;;  %2098 = vmatprep.subr.bf16.mxu1 %v2097_v40  ;;  %v1182_v47 = vld [vmem:[%s3890_s5] sm:$0xff]  ;;  %v2131_v48 = vpack.c.bf16 %v1185_v46, %v1183_v45  ;;  %v1219_v46 = vld [vmem:[%s3890_s5 + $0x128] sm:$0xff] }
  0x4b   : > { %2056 = vmatpush1.bf16.msra.mxu0 %v2055_v52  ;;  %2100 = vmatpush1.bf16.msra.mxu1 %v2099_v43  ;;  %v2133_v52 = vpack.c.bf16 %v1184_v49, %v1182_v47  ;;  %v1216_v43 = vld [vmem:[%s3890_s5 + $0x110] sm:$0xff]  ;;  %v1221_v47 = vld [vmem:[%s3890_s5 + $0x138] sm:$0xff] }
  0x4c   : > { %2058 = vmatprep.subr.bf16.mxu0 %v2057_v53  ;;  %2101 = vmatprep.subr.bf16.mxu1 %v2512_v44  ;;  %v2135_v53 = vpack.c.bf16 %v1189_v51, %v1187_v50  ;;  %v2165_v51 = vpack.c.bf16 %v1216_v43, %v1214_v42 }
  0x4f   : > { %2060 = vmatpush1.bf16.msra.mxu0 %v2059_v56  ;;  %v1191_v56 = vld [vmem:[%s3890_s5 + $0x48] sm:$0xff] }
  0x50   : > { %2132 = vmatprep.subr.bf16.mxu0 %v2131_v48 }
  0x52   : > { %494 = vmatmul.mubr.f32.vlgmr.msra.gmra.mrb[0].mxu0 %v337_v57  ;;  %v1193_v57 = vld [vmem:[%s3890_s5 + $0x58] sm:$0xff] }
  0x53   : > { %499 = vmatprep.mubr.f32.mxu0 %v340_v58  ;;  %2134 = vmatpush1.bf16.msra.mxu0 %v2133_v52  ;;  %v2137_v58 = vpack.c.bf16 %v1188_v55, %v1186_v54  ;;  %v2167_v55 = vpack.c.bf16 %v1221_v47, %v1219_v46 }
  0x54   : > { %2136 = vmatprep.subr.bf16.mxu0 %v2135_v53 }
  0x56   : > { %500 = vmatmul.mubr.f32.gmra.mrb[2].mxu0 %v339_v59  ;;  %v2139_v59 = vpack.c.bf16 %v1193_v57, %v1191_v56 }
  0x57   : > { %505 = vmatprep.mubr.f32.mxu0 %v342_v60  ;;  %v1190_v60 = vld [vmem:[%s3890_s5 + $0x40] sm:$0xff]  ;;  %2138 = vmatpush1.bf16.msra.mxu0 %v2137_v58 }
  0x58   : > { %2140 = vmatprep.subr.bf16.mxu0 %v2139_v59 }
  0x5a   : > { %506 = vmatmul.mubr.f32.gmra.mrb[4].mxu0 %v341_v61  ;;  %v1192_v61 = vld [vmem:[%s3890_s5 + $0x50] sm:$0xff] }
  0x5b   : > { %511 = vmatprep.mubr.f32.mxu0 %v344_v62  ;;  %v1195_v62 = vld [vmem:[%s3890_s5 + $0x68] sm:$0xff] }
  0x5e   : > { %512 = vmatmul.mubr.f32.gmra.mrb[6].mxu0 %v343_v63  ;;  %v1197_v63 = vld [vmem:[%s3890_s5 + $0x78] sm:$0xff] }
  0x5f   : > { %517 = vmatprep.mubr.f32.mxu0 %v346_v0  ;;  %v2141_v0 = vpack.c.bf16 %v1192_v61, %v1190_v60 }
  0x61   : > { %2142 = vmatpush1.bf16.msra.mxu0 %v2141_v0 }
  0x62   : > { %518 = vmatmul.mubr.f32.gmra.mrb[8].mxu0 %v345_v1  ;;  %v2143_v1 = vpack.c.bf16 %v1197_v63, %v1195_v62 }
  0x63   : > { %523 = vmatprep.mubr.f32.mxu0 %v348_v2  ;;  %v1194_v2 = vld [vmem:[%s3890_s5 + $0x60] sm:$0xff] }
  0x64   : > { %2144 = vmatprep.subr.bf16.mxu0 %v2143_v1 }
  0x66   : > { %524 = vmatmul.mubr.f32.gmra.mrb[10].mxu0 %v347_v3  ;;  %v1196_v3 = vld [vmem:[%s3890_s5 + $0x70] sm:$0xff] }
  0x67   : > { %529 = vmatprep.mubr.f32.mxu0 %v350_v4  ;;  %v1199_v4 = vld [vmem:[%s3890_s5 + $0x88] sm:$0xff] }
  0x6a   : > { %530 = vmatmul.mubr.f32.gmra.mrb[12].mxu0 %v349_v5  ;;  %v1201_v5 = vld [vmem:[%s3890_s5 + $0x98] sm:$0xff] }
  0x6b   : > { %535 = vmatprep.mubr.f32.mxu0 %v352_v6  ;;  %v2145_v6 = vpack.c.bf16 %v1196_v3, %v1194_v2  ;;  %v2147_v8 = vpack.c.bf16 %v1201_v5, %v1199_v4 }
  0x6d   : > { %2146 = vmatpush1.bf16.msra.mxu0 %v2145_v6 }
  0x6e   : > { %536 = vmatmul.mubr.f32.gmra.mrb[14].mxu0 %v351_v7  ;;  %v419_v7 = vlaneseq  ;;  %2148 = vmatprep.subr.bf16.mxu0 %v2147_v8 }
  0x70   : > { %v3016_v14 = vshrl.u32 %v419_v7, 7 }
  0x71   : > { %2150 = vmatpush1.bf16.msra.mxu0 %v2149_v13 }
  0x72   : > { %v3031_v21 = vsub.s32 0, %v3016_v14  ;;  %2152 = vmatprep.subr.bf16.mxu0 %v2151_v15  ;;  %v3043_v26 = vsub.s32 1, %v3016_v14 }
  0x74   : > { %v3052_v30 = vrot.slane %v417_v25, %v3031_v21  ;;  %v3061_v34 = vrot.slane %v417_v25, %v3043_v26 }
  0x75   : > { %2154 = vmatpush1.bf16.msra.mxu0 %v2153_v20 }
  0x76   : > { %2156 = vmatprep.subr.bf16.mxu0 %v2155_v22 }
  0x79   : > { %2158 = vmatpush1.bf16.msra.mxu0 %v2157_v29 }
  0x7a   : > { %2160 = vmatprep.subr.bf16.mxu0 %v2159_v31 }
  0x7d   : > { %2162 = vmatpush1.bf16.msra.mxu0 %v2161_v38 }
  0x7e   : > { %2164 = vmatprep.subr.bf16.mxu0 %v2163_v41 }
  0x81   : > { %2166 = vmatpush1.bf16.msra.mxu0 %v2165_v51  ;;  %v3153_v51 = vld [vmem:[%s3888_s3 + $0x58] sm:$0xff] }
  0x82   : > { %2168 = vmatprep.subr.bf16.mxu0 %v2167_v55 }
 0x125   : > { %v495_v37 = vpop.f32.mrb[0].mxu0 }
 0x126   : > { %v3070_v39 = vadd.f32 %v495_v37, %v3052_v30  ;;  %v497_v40 = vpop.f32.mrb[1].mxu0  ;;  %v2102_v37 = vpack.c.bf16 %v3127_v24, %v3122_v23 }
 0x127   : > { %v3079_v45 = vadd.f32 %v497_v40, %v3061_v34 }
 0x128   : > { %v558_v48 = vmin.f32 %v3070_v39, 0.0  ;;  %vm542_vm1 = vcmp.gt.f32.partialorder %v3070_v39, 0.0 }
 0x129   : > { %v559_v49 = vmin.f32 %v3079_v45, 0.0  ;;  %v501_v50 = vpop.f32.mrb[2].mxu0  ;;  %vm543_vm2 = vcmp.gt.f32.partialorder %v3079_v45, 0.0 }
 0x12a   : > { %v574_v52 = vmul.f32 1.442695, %v558_v48  ;;  %v3090_v53 = vadd.f32 %v501_v50, %v3052_v30  ;;  %v503_v54 = vpop.f32.mrb[3].mxu0  ;;  %v3148_v50 = vld [vmem:[%s3888_s3 + $0x40] sm:$0xff] }
 0x12b   : > { %v576_v56 = vmul.f32 1.442695, %v559_v49  ;;  %v3093_v57 = vadd.f32 %v503_v54, %v3061_v34 }
 0x12c   : > { %2336 = vpow2.f32 %v574_v52  ;;  %v560_v58 = vmin.f32 %v3090_v53, 0.0  ;;  %vm544_vm4 = vcmp.gt.f32.partialorder %v3090_v53, 0.0 }
 0x12d   : > { %2338 = vpow2.f32 %v576_v56  ;;  %v561_v59 = vmin.f32 %v3093_v57, 0.0  ;;  %v507_v60 = vpop.f32.mrb[4].mxu0  ;;  %vm545_vm3 = vcmp.gt.f32.partialorder %v3093_v57, 0.0 }
 0x12e   : > { %v578_v61 = vmul.f32 1.442695, %v560_v58  ;;  %v3098_v62 = vadd.f32 %v507_v60, %v3052_v30  ;;  %v509_v63 = vpop.f32.mrb[5].mxu0 }
 0x12f   : > { %v580_v0 = vmul.f32 1.442695, %v561_v59  ;;  %v3101_v1 = vadd.f32 %v509_v63, %v3061_v34 }
 0x130   : > { %2340 = vpow2.f32 %v578_v61  ;;  %v562_v2 = vmin.f32 %v3098_v62, 0.0  ;;  %vm546_vm7 = vcmp.gt.f32.partialorder %v3098_v62, 0.0 }
 0x131   : > { %2342 = vpow2.f32 %v580_v0  ;;  %v563_v3 = vmin.f32 %v3101_v1, 0.0  ;;  %v513_v4 = vpop.f32.mrb[6].mxu0  ;;  %vm547_vm5 = vcmp.gt.f32.partialorder %v3101_v1, 0.0 }
 0x132   : > { %v3106_v5 = vadd.f32 %v513_v4, %v3052_v30  ;;  %v515_v6 = vpop.f32.mrb[7].mxu0  ;;  %v582_v7 = vmul.f32 1.442695, %v562_v2 }
 0x133   : > { %v584_v8 = vmul.f32 1.442695, %v563_v3  ;;  %v3109_v9 = vadd.f32 %v515_v6, %v3061_v34  ;;  %v2105_v3 = vpack.c.bf16 %v3153_v51, %v3148_v50 }
 0x134   : > { %v564_v10 = vmin.f32 %v3106_v5, 0.0  ;;  %vm548_vm8 = vcmp.gt.f32.partialorder %v3106_v5, 0.0 }
 0x135   : > { %2344 = vpow2.f32 %v584_v8  ;;  %v565_v11 = vmin.f32 %v3109_v9, 0.0  ;;  %v519_v12 = vpop.f32.mrb[8].mxu0  ;;  %vm549_vm6 = vcmp.gt.f32.partialorder %v3109_v9, 0.0 }
 0x136   : > { %v2337_v13 = vpop.eup %2336  ;;  %v586_v15 = vmul.f32 1.442695, %v564_v10  ;;  %v3114_v16 = vadd.f32 %v519_v12, %v3052_v30  ;;  %v521_v17 = vpop.f32.mrb[9].mxu0  ;;  %2346 = vpow2.f32 %v582_v7 }
 0x137   : > { %v2339_v18 = vpop.eup %2338  ;;  %v1901_v19 = vadd.f32 -1.0, %v2337_v13  ;;  %v588_v20 = vmul.f32 1.442695, %v565_v11  ;;  %v3117_v22 = vadd.f32 %v521_v17, %v3061_v34 }
 0x138   : > { %2348 = vpow2.f32 %v586_v15  ;;  %v566_v25 = vmin.f32 %v3114_v16, 0.0  ;;  %v1902_v27 = vadd.f32 -1.0, %v2339_v18  ;;  %vm550_vm10 = vcmp.gt.f32.partialorder %v3114_v16, 0.0 }
 0x139   : > { %2350 = vpow2.f32 %v588_v20  ;;  %v567_v28 = vmin.f32 %v3117_v22, 0.0  ;;  %v525_v29 = vpop.f32.mrb[10].mxu0  ;;  %v622_v42 = vmul.f32 1.6732632, %v1901_v19  ;;  %vm551_vm9 = vcmp.gt.f32.partialorder %v3117_v22, 0.0 }
 0x13a   : > { %v2341_v31 = vpop.eup %2340  ;;  %v590_v32 = vmul.f32 1.442695, %v566_v25  ;;  %v3132_v33 = vadd.f32 %v525_v29, %v3052_v30  ;;  %v527_v35 = vpop.f32.mrb[11].mxu0  ;;  %v623_v36 = vmul.f32 1.6732632, %v1902_v27 }
 0x13b   : > { %v2343_v38 = vpop.eup %2342  ;;  %v592_v40 = vmul.f32 1.442695, %v567_v28  ;;  %v3138_v41 = vadd.f32 %v527_v35, %v3061_v34  ;;  %v1903_v52 = vadd.f32 -1.0, %v2341_v31  ;;  %v638_v63 = vsel %vm542_vm1, %v3070_v39, %v622_v42  ;;  %v687_v35 = vld [vmem:[%s3888_s3 + $0x88] sm:$0xff] }
 0x13c   : > { %v1904_v43 = vadd.f32 -1.0, %v2343_v38  ;;  %2352 = vpow2.f32 %v590_v32  ;;  %v568_v46 = vmin.f32 %v3132_v33, 0.0  ;;  %v639_v49 = vsel %vm543_vm2, %v3079_v45, %v623_v36  ;;  %v684_v32 = vld [vmem:[%s3888_s3 + $0x70] sm:$0xff] }
 0x13d   : > { %2354 = vpow2.f32 %v592_v40  ;;  %v569_v47 = vmin.f32 %v3138_v41, 0.0  ;;  %v531_v48 = vpop.f32.mrb[12].mxu0  ;;  %v3161_v61 = vmul.f32 1.050701, %v639_v49  ;;  %v3178_v11 = vmul.f32 1.050701, %v638_v63 }
 0x13e   : > { %v625_v54 = vmul.f32 1.6732632, %v1904_v43  ;;  %v594_v55 = vmul.f32 1.442695, %v568_v46  ;;  %v3156_v56 = vadd.f32 %v531_v48, %v3052_v30  ;;  %v533_v58 = vpop.f32.mrb[13].mxu0  ;;  %vm553_vm11 = vcmp.gt.f32.partialorder %v3138_v41, 0.0 }
 0x13f   : > { %v2345_v59 = vpop.eup %2344  ;;  %v596_v60 = vmul.f32 1.442695, %v569_v47  ;;  %v3159_v45 = vadd.f32 %v533_v58, %v3061_v34  ;;  %1917 = vmatprep.mubr.msk.f32.mxu1 %vm747_vm0, %v3161_v61  ;;  %v624_v19 = vmul.f32 1.6732632, %v1903_v52  ;;  %v2108_v47 = vpack.c.bf16 %v687_v35, %v684_v32  ;;  %v690_v52 = vld [vmem:[%s3888_s3 + $0xa0] sm:$0xff] }
 0x140   : > { %v641_v0 = vsel %vm545_vm3, %v3093_v57, %v625_v54  ;;  %v1906_v2 = vadd.f32 -1.0, %v2345_v59  ;;  %2356 = vpow2.f32 %v594_v55  ;;  %v2347_v4 = vpop.eup %2346  ;;  %v570_v7 = vmin.f32 %v3156_v56, 0.0  ;;  %837 = vmatmul.mubr.f32.vlgmr.msra.gmra.mrb[0].mxu1 %v3178_v11  ;;  %v693_v54 = vld [vmem:[%s3888_s3 + $0xb8] sm:$0xff] }
 0x141   : > { %v3172_v6 = vmul.f32 1.050701, %v641_v0  ;;  %2358 = vpow2.f32 %v596_v60  ;;  %v537_v39 = vpop.f32.mrb[14].mxu0  ;;  %v571_v57 = vmin.f32 %v3159_v45, 0.0  ;;  %v1905_v20 = vadd.f32 -1.0, %v2347_v4  ;;  %2103 = vmatpush1.bf16.msra.mxu1 %v2102_v37 }
 0x142   : > { %v2349_v8 = vpop.eup %2348  ;;  %v627_v10 = vmul.f32 1.6732632, %v1906_v2  ;;  %v3181_v12 = vadd.f32 %v537_v39, %v3052_v30  ;;  %v539_v13 = vpop.f32.mrb[15].mxu0  ;;  %v598_v17 = vmul.f32 1.442695, %v570_v7  ;;  %2104 = vmatprep.subr.bf16.mxu1 %v2512_v44  ;;  %v2111_v4 = vpack.c.bf16 %v693_v54, %v690_v52  ;;  %v699_v39 = vld [vmem:[%s3888_s3 + $0xe8] sm:$0xff] }
 0x143   : > { %v2351_v15 = vpop.eup %2350  ;;  %v3185_v18 = vadd.f32 %v539_v13, %v3061_v34  ;;  %v600_v25 = vmul.f32 1.442695, %v571_v57  ;;  %v1907_v30 = vadd.f32 -1.0, %v2349_v8  ;;  %1918 = vmatprep.mubr.msk.f32.mxu1 %vm747_vm0, %v3172_v6  ;;  %vm552_vm12 = vcmp.gt.f32.partialorder %v3132_v33, 0.0  ;;  %v723_v52 = vld [vmem:[%s3888_s3 + $0x1a8] sm:$0xff]  ;;  %v726_v54 = vld [vmem:[%s3888_s3 + $0x1c0] sm:$0xff] }
 0x144   : > { %v643_v23 = vsel %vm547_vm5, %v3101_v1, %v627_v10  ;;  %v1908_v24 = vadd.f32 -1.0, %v2351_v15  ;;  %2360 = vpow2.f32 %v598_v17  ;;  %v572_v28 = vmin.f32 %v3181_v12, 0.0 }
 0x145   : > { %v3189_v27 = vmul.f32 1.050701, %v643_v23  ;;  %2362 = vpow2.f32 %v600_v25  ;;  %v573_v31 = vmin.f32 %v3185_v18, 0.0  ;;  %v640_v1 = vsel %vm544_vm4, %v3090_v53, %v624_v19  ;;  %2106 = vmatpush1.bf16.msra.mxu1 %v2105_v3  ;;  %v702_v23 = vld [vmem:[%s3888_s3 + $0x100] sm:$0xff]  ;;  %v705_v25 = vld [vmem:[%s3888_s3 + $0x118] sm:$0xff] }
 0x146   : > { %v2353_v34 = vpop.eup %2352  ;;  %v629_v29 = vmul.f32 1.6732632, %v1908_v24  ;;  %v602_v38 = vmul.f32 1.442695, %v572_v28  ;;  %v3206_v40 = vmul.f32 1.050701, %v640_v1  ;;  %2107 = vmatprep.subr.bf16.mxu1 %v2512_v44  ;;  %v2117_v35 = vpack.c.bf16 %v705_v25, %v702_v23 }
 0x147   : > { %v2355_v36 = vpop.eup %2354  ;;  %v1909_v37 = vadd.f32 -1.0, %v2353_v34  ;;  %v604_v46 = vmul.f32 1.442695, %v573_v31  ;;  %v626_v53 = vmul.f32 1.6732632, %v1905_v20  ;;  %vm555_vm13 = vcmp.gt.f32.partialorder %v3159_v45, 0.0 }
 0x148   : > { %v645_v42 = vsel %vm549_vm6, %v3109_v9, %v629_v29  ;;  %v1910_v43 = vadd.f32 -1.0, %v2355_v36  ;;  %2364 = vpow2.f32 %v602_v38  ;;  %843 = vmatmul.mubr.f32.gmra.mrb[2].mxu1 %v3206_v40  ;;  %v628_v48 = vmul.f32 1.6732632, %v1907_v30  ;;  %v708_v36 = vld [vmem:[%s3888_s3 + $0x130] sm:$0xff]  ;;  %v1238_v25 = vld [vmem:[%s3890_s5 + $0x1c0] sm:$0xff] }
 0x149   : > { %v3211_v50 = vmul.f32 1.050701, %v645_v42  ;;  %2366 = vpow2.f32 %v604_v46  ;;  %1919 = vmatprep.mubr.msk.f32.mxu1 %vm747_vm0, %v3189_v27  ;;  %v642_v9 = vsel %vm546_vm7, %v3098_v62, %v626_v53  ;;  %v630_v59 = vmul.f32 1.6732632, %v1909_v37  ;;  %2109 = vmatpush1.bf16.msra.mxu1 %v2108_v47 }
 0x14a   : > { %v2357_v49 = vpop.eup %2356  ;;  %v631_v51 = vmul.f32 1.6732632, %v1910_v43  ;;  %v3225_v58 = vmul.f32 1.050701, %v642_v9  ;;  %v644_v0 = vsel %vm548_vm8, %v3106_v5, %v628_v48  ;;  %2110 = vmatprep.subr.bf16.mxu1 %v2512_v44  ;;  %v696_v5 = vld [vmem:[%s3888_s3 + $0xd0] sm:$0xff]  ;;  %vm554_vm14 = vcmp.gt.f32.partialorder %v3156_v56, 0.0 }
 0x14b   : > { %v2359_v55 = vpop.eup %2358  ;;  %v1911_v60 = vadd.f32 -1.0, %v2357_v49  ;;  %v646_v13 = vsel %vm550_vm10, %v3114_v16, %v630_v59  ;;  %v2114_v20 = vpack.c.bf16 %v699_v39, %v696_v5  ;;  %vm557_vm15 = vcmp.gt.f32.partialorder %v3185_v18, 0.0  ;;  %v714_v48 = vld [vmem:[%s3888_s3 + $0x160] sm:$0xff]  ;;  %v720_v9 = vld [vmem:[%s3888_s3 + $0x190] sm:$0xff]  ;;  %v1233_v5 = vld [vmem:[%s3890_s5 + $0x198] sm:$0xff] }
 0x14c   : > { %v647_v62 = vsel %vm551_vm9, %v3117_v22, %v631_v51  ;;  %v1912_v63 = vadd.f32 -1.0, %v2359_v55  ;;  %849 = vmatmul.mubr.f32.gmra.mrb[4].mxu1 %v3225_v58  ;;  %v3237_v22 = vmul.f32 1.050701, %v644_v0  ;;  %v662_v16 = vmul.f32 1.050701, %v646_v13  ;;  %v729_v55 = vld [vmem:[%s3888_s3 + $0x1d8] sm:$0xff] }
 0x14d   : > { %v3230_v2 = vmul.f32 1.050701, %v647_v62  ;;  %1920 = vmatprep.mubr.msk.f32.mxu1 %vm747_vm0, %v3211_v50  ;;  %v632_v15 = vmul.f32 1.6732632, %v1911_v60  ;;  %2112 = vmatpush1.bf16.msra.mxu1 %v2111_v4  ;;  %vm556_vm1 = vcmp.gt.f32.partialorder %v3181_v12, 0.0  ;;  %v2129_v59 = vpack.c.bf16 %v729_v55, %v726_v54  ;;  %v1224_v62 = vld [vmem:[%s3890_s5 + $0x150] sm:$0xff] }
 0x14e   : > { %v633_v3 = vmul.f32 1.6732632, %v1912_v63  ;;  %v2361_v7 = vpop.eup %2360  ;;  %2113 = vmatprep.subr.bf16.mxu1 %v2512_v44  ;;  %v1227_v63 = vld [vmem:[%s3890_s5 + $0x168] sm:$0xff]  ;;  %v1229_v0 = vld [vmem:[%s3890_s5 + $0x178] sm:$0xff]  ;;  %v1228_v4 = vld [vmem:[%s3890_s5 + $0x170] sm:$0xff] }
 0x14f   : > { %v2363_v8 = vpop.eup %2362  ;;  %v1913_v57 = vadd.f32 -1.0, %v2361_v7  ;;  %v648_v34 = vsel %vm552_vm12, %v3132_v33, %v632_v15  ;;  %v1235_v13 = vld [vmem:[%s3890_s5 + $0x1a8] sm:$0xff]  ;;  %v1237_v15 = vld [vmem:[%s3890_s5 + $0x1b8] sm:$0xff] }
 0x150   : > { %v649_v10 = vsel %vm553_vm11, %v3138_v41, %v633_v3  ;;  %v1914_v17 = vadd.f32 -1.0, %v2363_v8  ;;  %855 = vmatmul.mubr.f32.gmra.mrb[6].mxu1 %v3237_v22  ;;  %v664_v33 = vmul.f32 1.050701, %v648_v34  ;;  %v1226_v3 = vld [vmem:[%s3890_s5 + $0x160] sm:$0xff]  ;;  %v1243_v34 = vld [vmem:[%s3890_s5 + $0x1e8] sm:$0xff]  ;;  %v1261_v55 = vld [vmem:[%s3890_s5 + $0x278] sm:$0xff] }
 0x151   : > { %v3248_v19 = vmul.f32 1.050701, %v649_v10  ;;  %1921 = vmatprep.mubr.msk.f32.mxu1 %vm747_vm0, %v3230_v2  ;;  %v634_v29 = vmul.f32 1.6732632, %v1913_v57  ;;  %2115 = vmatpush1.bf16.msra.mxu1 %v2114_v20  ;;  %v2177_v7 = vpack.c.bf16 %v1228_v4, %v1226_v3  ;;  %v1230_v8 = vld [vmem:[%s3890_s5 + $0x180] sm:$0xff]  ;;  %v1232_v10 = vld [vmem:[%s3890_s5 + $0x190] sm:$0xff] }
 0x152   : > { %v2365_v24 = vpop.eup %2364  ;;  %v635_v41 = vmul.f32 1.6732632, %v1914_v17  ;;  %2116 = vmatprep.subr.bf16.mxu1 %v2512_v44  ;;  %v2181_v57 = vpack.c.bf16 %v1232_v10, %v1230_v8  ;;  %v2183_v17 = vpack.c.bf16 %v1237_v15, %v1235_v13  ;;  %v1236_v20 = vld [vmem:[%s3890_s5 + $0x1b0] sm:$0xff]  ;;  %v1259_v54 = vld [vmem:[%s3890_s5 + $0x268] sm:$0xff] }
 0x153   : > { %v2367_v30 = vpop.eup %2366  ;;  %v1915_v28 = vadd.f32 -1.0, %v2365_v24  ;;  %v650_v38 = vsel %vm554_vm14, %v3156_v56, %v634_v29  ;;  %v717_v56 = vld [vmem:[%s3888_s3 + $0x178] sm:$0xff]  ;;  %v1239_v24 = vld [vmem:[%s3890_s5 + $0x1c8] sm:$0xff] }
 0x154   : > { %v651_v31 = vsel %vm555_vm13, %v3159_v45, %v635_v41  ;;  %v1916_v1 = vadd.f32 -1.0, %v2367_v30  ;;  %861 = vmatmul.mubr.f32.gmra.mrb[8].mxu1 %v662_v16  ;;  %v711_v45 = vld [vmem:[%s3888_s3 + $0x148] sm:$0xff]  ;;  %v666_v47 = vmul.f32 1.050701, %v650_v38  ;;  %v2123_v49 = vpack.c.bf16 %v717_v56, %v714_v48  ;;  %v1241_v41 = vld [vmem:[%s3890_s5 + $0x1d8] sm:$0xff]  ;;  %v1240_v30 = vld [vmem:[%s3890_s5 + $0x1d0] sm:$0xff] }
 0x155   : > { %v667_v32 = vmul.f32 1.050701, %v651_v31  ;;  %1922 = vmatprep.mubr.msk.f32.mxu1 %vm747_vm0, %v3248_v19  ;;  %v636_v42 = vmul.f32 1.6732632, %v1915_v28  ;;  %2118 = vmatpush1.bf16.msra.mxu1 %v2117_v35  ;;  %v2120_v53 = vpack.c.bf16 %v711_v45, %v708_v36  ;;  %v2189_v28 = vpack.c.bf16 %v1240_v30, %v1238_v25  ;;  %v1245_v29 = vld [vmem:[%s3890_s5 + $0x1f8] sm:$0xff]  ;;  %v1247_v36 = vld [vmem:[%s3890_s5 + $0x208] sm:$0xff] }
 0x156   : > { %v637_v37 = vmul.f32 1.6732632, %v1916_v1  ;;  %2119 = vmatprep.subr.bf16.mxu1 %v2512_v44  ;;  %v2191_v31 = vpack.c.bf16 %v1245_v29, %v1243_v34  ;;  %v1242_v1 = vld [vmem:[%s3890_s5 + $0x1e0] sm:$0xff]  ;;  %v1248_v38 = vld [vmem:[%s3890_s5 + $0x210] sm:$0xff] }
 0x157   : > { %v1252_v48 = vld [vmem:[%s3890_s5 + $0x230] sm:$0xff] }
 0x158   : > { %v653_v43 = vsel %vm557_vm15, %v3185_v18, %v637_v37  ;;  %867 = vmatmul.mubr.f32.gmra.mrb[10].mxu1 %v664_v33  ;;  %v652_v18 = vsel %vm556_vm1, %v3181_v12, %v636_v42  ;;  %v2126_v12 = vpack.c.bf16 %v723_v52, %v720_v9  ;;  %v1249_v37 = vld [vmem:[%s3890_s5 + $0x218] sm:$0xff]  ;;  %v1254_v9 = vld [vmem:[%s3890_s5 + $0x240] sm:$0xff]  ;;  %v1256_v52 = vld [vmem:[%s3890_s5 + $0x250] sm:$0xff] }
 0x159   : > { %v669_v46 = vmul.f32 1.050701, %v653_v43  ;;  %1923 = vmatprep.mubr.msk.f32.mxu1 %vm747_vm0, %v667_v32  ;;  %2121 = vmatpush1.bf16.msra.mxu1 %v2120_v53  ;;  %v668_v51 = vmul.f32 1.050701, %v652_v18  ;;  %v2195_v45 = vpack.c.bf16 %v1249_v37, %v1247_v36  ;;  %v1251_v43 = vld [vmem:[%s3890_s5 + $0x228] sm:$0xff] }
 0x15a   : > { %2122 = vmatprep.subr.bf16.mxu1 %v2512_v44  ;;  %v1255_v18 = vld [vmem:[%s3890_s5 + $0x248] sm:$0xff] }
 0x15c   : > { %873 = vmatmul.mubr.f32.gmra.mrb[12].mxu1 %v666_v47 }
 0x15d   : > { %1924 = vmatprep.mubr.msk.f32.mxu1 %vm747_vm0, %v669_v46  ;;  %2124 = vmatpush1.bf16.msra.mxu1 %v2123_v49  ;;  %v1257_v49 = vld [vmem:[%s3890_s5 + $0x258] sm:$0xff] }
 0x15e   : > { %2125 = vmatprep.subr.bf16.mxu1 %v2512_v44 }
 0x160   : > { %879 = vmatmul.mubr.f32.gmra.mrb[14].mxu1 %v668_v51 }
 0x161   : > { %1925 = vmatprep.mubr.msk.f32.mxu1 %vm747_vm0, %v3161_v61  ;;  %2127 = vmatpush1.bf16.msra.mxu1 %v2126_v12  ;;  %v1218_v61 = vld [vmem:[%s3890_s5 + $0x120] sm:$0xff]  ;;  %v2205_v12 = vpack.c.bf16 %v1256_v52, %v1254_v9 }
 0x162   : > { %2128 = vmatprep.subr.bf16.mxu1 %v2512_v44 }
 0x165   : > { %2130 = vmatpush1.bf16.msra.mxu1 %v2129_v59  ;;  %v2207_v59 = vpack.c.bf16 %v1261_v55, %v1259_v54 }
 0x166   : > { %2196 = vmatprep.subr.bf16.mxu1 %v2195_v45 }
 0x168   : > { %950 = vmatmul.mubr.f32.vlgmr.msra.gmra.mrb[16].mxu1 %v3178_v11 }
 0x169   : > { %1926 = vmatprep.mubr.msk.f32.mxu1 %vm747_vm0, %v3172_v6  ;;  %v1220_v6 = vld [vmem:[%s3890_s5 + $0x130] sm:$0xff] }
 0x16a   : > { %v2169_v11 = vpack.c.bf16 %v1220_v6, %v1218_v61  ;;  %v1258_v61 = vld [vmem:[%s3890_s5 + $0x260] sm:$0xff]  ;;  %v1260_v6 = vld [vmem:[%s3890_s5 + $0x270] sm:$0xff] }
 0x16c   : > { %955 = vmatmul.mubr.f32.gmra.mrb[18].mxu1 %v3206_v40  ;;  %2170 = vmatpush1.bf16.msra.mxu0 %v2169_v11  ;;  %v1225_v40 = vld [vmem:[%s3890_s5 + $0x158] sm:$0xff]  ;;  %v2209_v11 = vpack.c.bf16 %v1260_v6, %v1258_v61 }
 0x16d   : > { %1927 = vmatprep.mubr.msk.f32.mxu1 %vm747_vm0, %v3189_v27  ;;  %v1223_v27 = vld [vmem:[%s3890_s5 + $0x148] sm:$0xff] }
 0x170   : > { %960 = vmatmul.mubr.f32.gmra.mrb[20].mxu1 %v3225_v58  ;;  %v1222_v58 = vld [vmem:[%s3890_s5 + $0x140] sm:$0xff] }
 0x171   : > { %1928 = vmatprep.mubr.msk.f32.mxu1 %vm747_vm0, %v3211_v50  ;;  %v2171_v50 = vpack.c.bf16 %v1225_v40, %v1223_v27  ;;  %v2173_v60 = vpack.c.bf16 %v1224_v62, %v1222_v58  ;;  %v2513_v27 = vmov 0.0   ;;  %v3452_v40 = vld [vmem:[%s3889_s4] sm:$0x7] }
 0x172   : > { %v3460_v58 = vrot.slane %v3452_v40, %v3043_v26 }
 0x173   : > { %2172 = vmatprep.subr.bf16.mxu0 %v2171_v50  ;;  %v3456_v50 = vrot.slane %v3452_v40, %v3031_v21 }
 0x174   : > { %965 = vmatmul.mubr.f32.gmra.mrb[22].mxu1 %v3237_v22  ;;  %2174 = vmatpush1.bf16.msra.mxu0 %v2173_v60  ;;  %v1231_v22 = vld [vmem:[%s3890_s5 + $0x188] sm:$0xff] }
 0x175   : > { %1929 = vmatprep.mubr.msk.f32.mxu1 %vm747_vm0, %v3230_v2  ;;  %v2175_v2 = vpack.c.bf16 %v1229_v0, %v1227_v63  ;;  %v2179_v39 = vpack.c.bf16 %v1233_v5, %v1231_v22 }
 0x177   : > { %2176 = vmatprep.subr.bf16.mxu0 %v2175_v2 }
 0x178   : > { %970 = vmatmul.mubr.f32.gmra.mrb[24].mxu1 %v662_v16  ;;  %2178 = vmatpush1.bf16.msra.mxu0 %v2177_v7  ;;  %v2187_v16 = vpack.c.bf16 %v1241_v41, %v1239_v24 }
 0x179   : > { %1930 = vmatprep.mubr.msk.f32.mxu1 %vm747_vm0, %v3248_v19  ;;  %2180 = vmatprep.subr.bf16.mxu0 %v2179_v39  ;;  %v1234_v19 = vld [vmem:[%s3890_s5 + $0x1a0] sm:$0xff] }
 0x17a   : > { %v2185_v23 = vpack.c.bf16 %v1236_v20, %v1234_v19 }
 0x17c   : > { %975 = vmatmul.mubr.f32.gmra.mrb[26].mxu1 %v664_v33  ;;  %2182 = vmatpush1.bf16.msra.mxu0 %v2181_v57  ;;  %v1246_v33 = vld [vmem:[%s3890_s5 + $0x200] sm:$0xff] }
 0x17d   : > { %1931 = vmatprep.mubr.msk.f32.mxu1 %vm747_vm0, %v667_v32  ;;  %2184 = vmatprep.subr.bf16.mxu0 %v2183_v17  ;;  %v1244_v32 = vld [vmem:[%s3890_s5 + $0x1f0] sm:$0xff]  ;;  %v2197_v42 = vpack.c.bf16 %v1248_v38, %v1246_v33 }
 0x17e   : > { %v2193_v35 = vpack.c.bf16 %v1244_v32, %v1242_v1 }
 0x17f   : > { %2198 = vmatpush1.bf16.msra.mxu1 %v2197_v42 }
 0x180   : > { %980 = vmatmul.mubr.f32.gmra.mrb[28].mxu1 %v666_v47  ;;  %2186 = vmatpush1.bf16.msra.mxu0 %v2185_v23  ;;  %v1250_v47 = vld [vmem:[%s3890_s5 + $0x220] sm:$0xff] }
 0x181   : > { %1932 = vmatprep.mubr.msk.f32.mxu1 %vm747_vm0, %v669_v46  ;;  %2188 = vmatprep.subr.bf16.mxu0 %v2187_v16  ;;  %v1253_v46 = vld [vmem:[%s3890_s5 + $0x238] sm:$0xff]  ;;  %v2201_v56 = vpack.c.bf16 %v1252_v48, %v1250_v47 }
 0x182   : > { %v2199_v53 = vpack.c.bf16 %v1253_v46, %v1251_v43 }
 0x184   : > { %985 = vmatmul.mubr.f32.gmra.mrb[30].mxu1 %v668_v51  ;;  %2190 = vmatpush1.bf16.msra.mxu0 %v2189_v28  ;;  %v2203_v51 = vpack.c.bf16 %v1257_v49, %v1255_v18 }
 0x185   : > { %2192 = vmatprep.subr.bf16.mxu0 %v2191_v31  ;;  %2200 = vmatprep.subr.bf16.mxu1 %v2199_v53 }
 0x186   : > { %2202 = vmatpush1.bf16.msra.mxu1 %v2201_v56  ;;  %1476 = vmatprep.mubr.f32.mxu1 %v2513_v27 }
 0x187   : > { %2204 = vmatprep.subr.bf16.mxu1 %v2203_v51 }
 0x188   : > { %2194 = vmatpush1.bf16.msra.mxu0 %v2193_v35 }
 0x189   : > { %2211 = vmatprep.subr.bf16.mxu0 %v2512_v44 }
 0x18a   : > { %2206 = vmatpush1.bf16.msra.mxu1 %v2205_v12 }
 0x18b   : > { %2208 = vmatprep.subr.bf16.mxu1 %v2207_v59  ;;  %v742_v59 = vsub.s32 2, %v3016_v14 }
 0x18e   : > { %2210 = vmatpush1.bf16.msra.mxu1 %v2209_v11 }
 0x18f   : > { %2241 = vmatprep.subr.bf16.mxu1 %v2512_v44 }
 0x213   : > { %v838_v62 = vpop.f32.mrb[0].mxu1 }
 0x214   : > { %v839_v60 = vadd.f32 %v838_v62, %v3456_v50  ;;  %v840_v63 = vpop.f32.mrb[1].mxu1 }
 0x215   : > { %v3464_v0 = vadd.f32 %v840_v63, %v3460_v58 }
 0x216   : > { %v1014_v2 = vmin.f32 %v839_v60, 0.0  ;;  %vm990_vm2 = vcmp.gt.f32.partialorder %v839_v60, 0.0 }
 0x217   : > { %v1015_v3 = vmin.f32 %v3464_v0, 0.0  ;;  %vm991_vm3 = vcmp.gt.f32.partialorder %v3464_v0, 0.0 }
 0x218   : > { %v1038_v4 = vmul.f32 1.442695, %v1014_v2 }
 0x219   : > { %v1040_v22 = vmul.f32 1.442695, %v1015_v3 }
 0x21a   : > { %2368 = vpow2.f32 %v1038_v4 }
 0x21b   : > { %v844_v7 = vpop.f32.mrb[2].mxu1  ;;  %2370 = vpow2.f32 %v1040_v22 }
 0x21c   : > { %v3468_v5 = vadd.f32 %v844_v7, %v3456_v50  ;;  %v846_v39 = vpop.f32.mrb[3].mxu1 }
 0x21d   : > { %v3471_v8 = vadd.f32 %v846_v39, %v3460_v58 }
 0x21e   : > { %v1017_v10 = vmin.f32 %v3468_v5, 0.0  ;;  %vm993_vm4 = vcmp.gt.f32.partialorder %v3468_v5, 0.0 }
 0x21f   : > { %v1018_v57 = vmin.f32 %v3471_v8, 0.0  ;;  %v850_v13 = vpop.f32.mrb[4].mxu1  ;;  %vm994_vm5 = vcmp.gt.f32.partialorder %v3471_v8, 0.0 }
 0x220   : > { %v1044_v15 = vmul.f32 1.442695, %v1017_v10  ;;  %v3476_v17 = vadd.f32 %v850_v13, %v3456_v50  ;;  %v852_v19 = vpop.f32.mrb[5].mxu1 }
 0x221   : > { %v1046_v20 = vmul.f32 1.442695, %v1018_v57  ;;  %v3479_v23 = vadd.f32 %v852_v19, %v3460_v58 }
 0x222   : > { %v1020_v24 = vmin.f32 %v3476_v17, 0.0  ;;  %vm996_vm6 = vcmp.gt.f32.partialorder %v3476_v17, 0.0 }
 0x223   : > { %2372 = vpow2.f32 %v1046_v20  ;;  %v1021_v41 = vmin.f32 %v3479_v23, 0.0  ;;  %v856_v16 = vpop.f32.mrb[6].mxu1  ;;  %vm997_vm7 = vcmp.gt.f32.partialorder %v3479_v23, 0.0 }
 0x224   : > { %2374 = vpow2.f32 %v1044_v15  ;;  %v1050_v25 = vmul.f32 1.442695, %v1020_v24  ;;  %v3484_v30 = vadd.f32 %v856_v16, %v3456_v50  ;;  %v858_v28 = vpop.f32.mrb[7].mxu1  ;;  %v2369_v1 = vpop.eup %2368 }
 0x225   : > { %v1052_v34 = vmul.f32 1.442695, %v1021_v41  ;;  %v3487_v29 = vadd.f32 %v858_v28, %v3460_v58  ;;  %v2371_v36 = vpop.eup %2370  ;;  %v1933_v37 = vadd.f32 -1.0, %v2369_v1 }
 0x226   : > { %v1023_v31 = vmin.f32 %v3484_v30, 0.0  ;;  %v1934_v42 = vadd.f32 -1.0, %v2371_v36  ;;  %vm999_vm8 = vcmp.gt.f32.partialorder %v3484_v30, 0.0 }
 0x227   : > { %2376 = vpow2.f32 %v1052_v34  ;;  %v1024_v32 = vmin.f32 %v3487_v29, 0.0  ;;  %v862_v35 = vpop.f32.mrb[8].mxu1  ;;  %v1110_v53 = vmul.f32 1.6732632, %v1933_v37  ;;  %vm1000_vm9 = vcmp.gt.f32.partialorder %v3487_v29, 0.0 }
 0x228   : > { %2378 = vpow2.f32 %v1050_v25  ;;  %v1056_v33 = vmul.f32 1.442695, %v1023_v31  ;;  %v3492_v45 = vadd.f32 %v862_v35, %v3456_v50  ;;  %v864_v38 = vpop.f32.mrb[9].mxu1  ;;  %v1111_v18 = vmul.f32 1.6732632, %v1934_v42 }
 0x229   : > { %v1058_v43 = vmul.f32 1.442695, %v1024_v32  ;;  %v3495_v46 = vadd.f32 %v864_v38, %v3460_v58  ;;  %v1134_v49 = vsel %vm990_vm2, %v839_v60, %v1110_v53 }
 0x22a   : > { %2380 = vpow2.f32 %v1056_v33  ;;  %v1026_v47 = vmin.f32 %v3492_v45, 0.0  ;;  %v1158_v62 = vmul.f32 1.050701, %v1134_v49  ;;  %v1135_v2 = vsel %vm991_vm3, %v3464_v0, %v1111_v18 }
 0x22b   : > { %2382 = vpow2.f32 %v1058_v43  ;;  %v1027_v48 = vmin.f32 %v3495_v46, 0.0  ;;  %v868_v56 = vpop.f32.mrb[10].mxu1  ;;  %v1159_v7 = vmul.f32 1.050701, %v1135_v2  ;;  %vm1003_vm10 = vcmp.gt.f32.partialorder %v3495_v46, 0.0 }
 0x22c   : > { %v1062_v51 = vmul.f32 1.442695, %v1026_v47  ;;  %v3500_v9 = vadd.f32 %v868_v56, %v3456_v50  ;;  %v870_v52 = vpop.f32.mrb[11].mxu1  ;;  %vm1002_vm11 = vcmp.gt.f32.partialorder %v3492_v45, 0.0 }
 0x22d   : > { %v2373_v12 = vpop.eup %2372  ;;  %v1064_v54 = vmul.f32 1.442695, %v1027_v48  ;;  %v3503_v55 = vadd.f32 %v870_v52, %v3460_v58  ;;  %1363 = vmatprep.mubr.f32.mxu0 %v1159_v7  ;;  %v3536_v48 = vrot.slane %v3452_v40, %v742_v59 }
 0x22e   : > { %v2375_v61 = vpop.eup %2374  ;;  %v1937_v6 = vadd.f32 -1.0, %v2373_v12  ;;  %2384 = vpow2.f32 %v1062_v51  ;;  %v1029_v11 = vmin.f32 %v3500_v9, 0.0  ;;  %1364 = vmatmul.mubr.f32.vlgmr.msra.gmra.mrb[16].mxu0 %v1158_v62  ;;  %vm1005_vm13 = vcmp.gt.f32.partialorder %v3500_v9, 0.0 }
 0x22f   : > { %2386 = vpow2.f32 %v1064_v54  ;;  %v1030_v60 = vmin.f32 %v3503_v55, 0.0  ;;  %v874_v63 = vpop.f32.mrb[12].mxu1  ;;  %v1936_v39 = vadd.f32 -1.0, %v2375_v61  ;;  %vm1006_vm12 = vcmp.gt.f32.partialorder %v3503_v55, 0.0 }
 0x230   : > { %v1068_v3 = vmul.f32 1.442695, %v1029_v11  ;;  %v3512_v4 = vadd.f32 %v874_v63, %v3456_v50  ;;  %v876_v14 = vpop.f32.mrb[13].mxu1  ;;  %v1114_v13 = vmul.f32 1.6732632, %v1937_v6 }
 0x231   : > { %v2377_v22 = vpop.eup %2376  ;;  %v1070_v10 = vmul.f32 1.442695, %v1030_v60  ;;  %v3515_v57 = vadd.f32 %v876_v14, %v3460_v58  ;;  %v1113_v37 = vmul.f32 1.6732632, %v1936_v39 }
 0x232   : > { %v2379_v15 = vpop.eup %2378  ;;  %2388 = vpow2.f32 %v1068_v3  ;;  %v1032_v0 = vmin.f32 %v3512_v4, 0.0  ;;  %v1138_v24 = vsel %vm994_vm5, %v3471_v8, %v1114_v13  ;;  %v1940_v16 = vadd.f32 -1.0, %v2377_v22 }
 0x233   : > { %2390 = vpow2.f32 %v1070_v10  ;;  %v1033_v19 = vmin.f32 %v3515_v57, 0.0  ;;  %v880_v20 = vpop.f32.mrb[14].mxu1  ;;  %v1162_v31 = vmul.f32 1.050701, %v1138_v24  ;;  %v1939_v32 = vadd.f32 -1.0, %v2379_v15 }
 0x234   : > { %v2381_v41 = vpop.eup %2380  ;;  %v1074_v25 = vmul.f32 1.442695, %v1032_v0  ;;  %v3524_v28 = vadd.f32 %v880_v20, %v3456_v50  ;;  %v882_v34 = vpop.f32.mrb[15].mxu1  ;;  %v1137_v42 = vsel %vm993_vm4, %v3468_v5, %v1113_v37  ;;  %v1117_v47 = vmul.f32 1.6732632, %v1940_v16 }
 0x235   : > { %v2383_v1 = vpop.eup %2382  ;;  %v1076_v35 = vmul.f32 1.442695, %v1033_v19  ;;  %v3527_v36 = vadd.f32 %v882_v34, %v3460_v58  ;;  %1369 = vmatprep.mubr.f32.mxu0 %v1162_v31  ;;  %v1942_v38 = vadd.f32 -1.0, %v2381_v41  ;;  %v1161_v58 = vmul.f32 1.050701, %v1137_v42 }
 0x236   : > { %v1943_v33 = vadd.f32 -1.0, %v2383_v1  ;;  %2392 = vpow2.f32 %v1074_v25  ;;  %v1035_v8 = vmin.f32 %v3524_v28, 0.0  ;;  %v1116_v51 = vmul.f32 1.6732632, %v1939_v32 }
 0x237   : > { %2394 = vpow2.f32 %v1076_v35  ;;  %v1036_v50 = vmin.f32 %v3527_v36, 0.0  ;;  %1370 = vmatmul.mubr.f32.gmra.mrb[18].mxu0 %v1161_v58  ;;  %v1141_v5 = vsel %vm997_vm7, %v3479_v23, %v1117_v47  ;;  %v1119_v59 = vmul.f32 1.6732632, %v1942_v38 }
 0x238   : > { %v2385_v43 = vpop.eup %2384  ;;  %v1080_v53 = vmul.f32 1.442695, %v1035_v8  ;;  %v1120_v12 = vmul.f32 1.6732632, %v1943_v33  ;;  %v1165_v54 = vmul.f32 1.050701, %v1141_v5  ;;  %v1140_v40 = vsel %vm996_vm6, %v3476_v17, %v1116_v51 }
 0x239   : > { %v2387_v56 = vpop.eup %2386  ;;  %v1945_v18 = vadd.f32 -1.0, %v2385_v43  ;;  %v1082_v49 = vmul.f32 1.442695, %v1036_v50  ;;  %v1164_v6 = vmul.f32 1.050701, %v1140_v40  ;;  %v1143_v3 = vsel %vm999_vm8, %v3484_v30, %v1119_v59 }
 0x23a   : > { %v1946_v52 = vadd.f32 -1.0, %v2387_v56  ;;  %2396 = vpow2.f32 %v1080_v53  ;;  %v1144_v11 = vsel %vm1000_vm9, %v3487_v29, %v1120_v12  ;;  %1375 = vmatprep.mubr.f32.mxu0 %v1165_v54  ;;  %v1167_v7 = vmul.f32 1.050701, %v1143_v3 }
 0x23b   : > { %2398 = vpow2.f32 %v1082_v49  ;;  %v1122_v60 = vmul.f32 1.6732632, %v1945_v18  ;;  %v1168_v23 = vmul.f32 1.050701, %v1144_v11  ;;  %1376 = vmatmul.mubr.f32.gmra.mrb[20].mxu0 %v1164_v6  ;;  %v951_v29 = vpop.f32.mrb[16].mxu1  ;;  %vm1009_vm14 = vcmp.gt.f32.partialorder %v3515_v57, 0.0 }
 0x23c   : > { %v2389_v61 = vpop.eup %2388  ;;  %v1123_v62 = vmul.f32 1.6732632, %v1946_v52  ;;  %v3553_v10 = vadd.f32 %v951_v29, %v3536_v48  ;;  %v953_v13 = vpop.f32.mrb[17].mxu1  ;;  %vm1008_vm15 = vcmp.gt.f32.partialorder %v3512_v4, 0.0  ;;  %vm1012_vm1 = vcmp.gt.f32.partialorder %v3527_v36, 0.0 }
 0x23d   : > { %v2391_v63 = vpop.eup %2390  ;;  %v1948_v2 = vadd.f32 -1.0, %v2389_v61  ;;  %1381 = vmatprep.mubr.f32.mxu0 %v1168_v23  ;;  %v1146_v15 = vsel %vm1002_vm11, %v3492_v45, %v1122_v60  ;;  %vm1011_vm2 = vcmp.gt.f32.partialorder %v3524_v28, 0.0  ;;  %vm1274_vm4 = vcmask 523264  }
 0x23e   : > { %v1949_v14 = vadd.f32 -1.0, %v2391_v63  ;;  %v1147_v17 = vsel %vm1003_vm10, %v3495_v46, %v1123_v62  ;;  %v1016_v24 = vmin.f32 %v3553_v10, 0.0  ;;  %v1170_v25 = vmul.f32 1.050701, %v1146_v15 }
 0x23f   : > { %v1171_v22 = vmul.f32 1.050701, %v1147_v17  ;;  %v1125_v19 = vmul.f32 1.6732632, %v1948_v2  ;;  %1382 = vmatmul.mubr.f32.gmra.mrb[22].mxu0 %v1167_v7  ;;  %v956_v16 = vpop.f32.mrb[18].mxu1  ;;  %vm992_vm3 = vcmp.gt.f32.partialorder %v3553_v10, 0.0 }
 0x240   : > { %v2393_v39 = vpop.eup %2392  ;;  %v1126_v0 = vmul.f32 1.6732632, %v1949_v14  ;;  %v1042_v45 = vmul.f32 1.442695, %v1016_v24  ;;  %v3561_v1 = vadd.f32 %v956_v16, %v3536_v48  ;;  %v958_v32 = vpop.f32.mrb[19].mxu1 }
 0x241   : > { %v2395_v30 = vpop.eup %2394  ;;  %v1951_v20 = vadd.f32 -1.0, %v2393_v39  ;;  %1387 = vmatprep.mubr.f32.mxu0 %v1171_v22  ;;  %v1149_v35 = vsel %vm1005_vm13, %v3500_v9, %v1125_v19 }
 0x242   : > { %v1952_v46 = vadd.f32 -1.0, %v2395_v30  ;;  %v1150_v41 = vsel %vm1006_vm12, %v3503_v55, %v1126_v0  ;;  %2400 = vpow2.f32 %v1042_v45  ;;  %v1019_v50 = vmin.f32 %v3561_v1, 0.0 }
 0x243   : > { %v1174_v34 = vmul.f32 1.050701, %v1150_v41  ;;  %v1128_v37 = vmul.f32 1.6732632, %v1951_v20  ;;  %1388 = vmatmul.mubr.f32.gmra.mrb[24].mxu0 %v1170_v25  ;;  %v961_v42 = vpop.f32.mrb[20].mxu1  ;;  %vm995_vm5 = vcmp.gt.f32.partialorder %v3561_v1, 0.0 }
 0x244   : > { %v2397_v31 = vpop.eup %2396  ;;  %v1129_v38 = vmul.f32 1.6732632, %v1952_v46  ;;  %v1173_v43 = vmul.f32 1.050701, %v1149_v35  ;;  %v1048_v58 = vmul.f32 1.442695, %v1019_v50  ;;  %v3569_v9 = vadd.f32 %v961_v42, %v3536_v48 }
 0x245   : > { %v2399_v33 = vpop.eup %2398  ;;  %v1954_v8 = vadd.f32 -1.0, %v2397_v31  ;;  %1393 = vmatprep.mubr.f32.mxu0 %v1174_v34  ;;  %v963_v47 = vpop.f32.mrb[21].mxu1  ;;  %v1152_v18 = vsel %vm1008_vm15, %v3512_v4, %v1128_v37 }
 0x246   : > { %v1955_v55 = vadd.f32 -1.0, %v2399_v33  ;;  %v1153_v53 = vsel %vm1009_vm14, %v3515_v57, %v1129_v38  ;;  %2402 = vpow2.f32 %v1048_v58  ;;  %v1022_v52 = vmin.f32 %v3569_v9, 0.0 }
 0x247   : > { %v1177_v56 = vmul.f32 1.050701, %v1153_v53  ;;  %v1131_v51 = vmul.f32 1.6732632, %v1954_v8  ;;  %1394 = vmatmul.mubr.f32.gmra.mrb[26].mxu0 %v1173_v43  ;;  %v966_v5 = vpop.f32.mrb[22].mxu1  ;;  %vm998_vm6 = vcmp.gt.f32.partialorder %v3569_v9, 0.0 }
 0x248   : > { %v1132_v49 = vmul.f32 1.6732632, %v1955_v55  ;;  %v1176_v12 = vmul.f32 1.050701, %v1152_v18  ;;  %v1054_v54 = vmul.f32 1.442695, %v1022_v52  ;;  %v3577_v40 = vadd.f32 %v966_v5, %v3536_v48 }
 0x249   : > { %1399 = vmatprep.mubr.f32.mxu0 %v1177_v56  ;;  %v968_v4 = vpop.f32.mrb[23].mxu1  ;;  %v1155_v61 = vsel %vm1011_vm2, %v3524_v28, %v1131_v51 }
 0x24a   : > { %v1156_v57 = vsel %vm1012_vm1, %v3527_v36, %v1132_v49  ;;  %2404 = vpow2.f32 %v1054_v54  ;;  %v1025_v6 = vmin.f32 %v3577_v40, 0.0  ;;  %v1179_v63 = vmul.f32 1.050701, %v1155_v61 }
 0x24b   : > { %v1180_v59 = vmul.f32 1.050701, %v1156_v57  ;;  %1400 = vmatmul.mubr.f32.gmra.mrb[28].mxu0 %v1176_v12  ;;  %v971_v11 = vpop.f32.mrb[24].mxu1  ;;  %vm1001_vm7 = vcmp.gt.f32.partialorder %v3577_v40, 0.0 }
 0x24c   : > { %v2401_v62 = vpop.eup %2400  ;;  %v1060_v60 = vmul.f32 1.442695, %v1025_v6  ;;  %v3582_v36 = vadd.f32 %v971_v11, %v3536_v48  ;;  %v973_v2 = vpop.f32.mrb[25].mxu1 }
 0x24d   : > { %1405 = vmatprep.mubr.f32.mxu0 %v1180_v59  ;;  %v1935_v23 = vadd.f32 -1.0, %v2401_v62  ;;  %v1656_v2 = vld [vmem:[%s3892_s7 + $0x18] sm:$0xff] }
 0x24e   : > { %2406 = vpow2.f32 %v1060_v60  ;;  %v1028_v3 = vmin.f32 %v3582_v36, 0.0  ;;  %vm1004_vm8 = vcmp.gt.f32.partialorder %v3582_v36, 0.0  ;;  %v1653_v60 = vld [vmem:[%s3892_s7] sm:$0xff] }
 0x24f   : > { %1406 = vmatmul.mubr.f32.gmra.mrb[30].mxu0 %v1179_v63  ;;  %v1112_v14 = vmul.f32 1.6732632, %v1935_v23  ;;  %v976_v28 = vpop.f32.mrb[26].mxu1 }
 0x250   : > { %v2403_v17 = vpop.eup %2402  ;;  %v1066_v29 = vmul.f32 1.442695, %v1028_v3  ;;  %v977_v7 = vadd.f32 %v976_v28, %v3536_v48  ;;  %v978_v22 = vpop.f32.mrb[27].mxu1  ;;  %v1657_v3 = vld [vmem:[%s3892_s7 + $0x20] sm:$0xff] }
 0x251   : > { %v1136_v39 = vsel %vm992_vm3, %v3553_v10, %v1112_v14  ;;  %v1938_v13 = vadd.f32 -1.0, %v2403_v17  ;;  %v1658_v14 = vld [vmem:[%s3892_s7 + $0x28] sm:$0xff]  ;;  %v1659_v17 = vld [vmem:[%s3892_s7 + $0x30] sm:$0xff]  ;;  %v1661_v22 = vld [vmem:[%s3892_s7 + $0x40] sm:$0xff] }
 0x252   : > { %v1160_v15 = vmul.f32 1.050701, %v1136_v39  ;;  %2408 = vpow2.f32 %v1066_v29  ;;  %v1031_v0 = vmin.f32 %v977_v7, 0.0  ;;  %vm1007_vm9 = vcmp.gt.f32.partialorder %v977_v7, 0.0  ;;  %v1660_v29 = vld [vmem:[%s3892_s7 + $0x38] sm:$0xff]  ;;  %v1662_v39 = vld [vmem:[%s3892_s7 + $0x48] sm:$0xff] }
 0x253   : > { %v1115_v19 = vmul.f32 1.6732632, %v1938_v13  ;;  %v981_v30 = vpop.f32.mrb[28].mxu1  ;;  %v2218_v28 = vpack.c.bf16 %v1658_v14, %v1657_v3  ;;  %v2224_v13 = vpack.c.bf16 %v1662_v39, %v1661_v22 }
 0x254   : > { %v2405_v20 = vpop.eup %2404  ;;  %v1072_v46 = vmul.f32 1.442695, %v1031_v0  ;;  %v982_v24 = vadd.f32 %v981_v30, %v3536_v48  ;;  %v983_v41 = vpop.f32.mrb[29].mxu1  ;;  %1957 = vmatmul.mubr.msk.f32.vlgmr.msra.gmra.mrb[32].mxu1 %vm1274_vm4, %v1160_v15  ;;  %v1663_v15 = vld [vmem:[%s3892_s7 + $0x50] sm:$0xff]  ;;  %v1664_v0 = vld [vmem:[%s3892_s7 + $0x58] sm:$0xff]  ;;  %v1665_v30 = vld [vmem:[%s3892_s7 + $0x60] sm:$0xff] }
 0x255   : > { %v1139_v16 = vsel %vm995_vm5, %v3561_v1, %v1115_v19  ;;  %v1941_v25 = vadd.f32 -1.0, %v2405_v20  ;;  %1482 = vmatprep.mubr.f32.mxu1 %v2513_v27  ;;  %v2227_v19 = vpack.c.bf16 %v1664_v0, %v1663_v15  ;;  %v1666_v20 = vld [vmem:[%s3892_s7 + $0x68] sm:$0xff]  ;;  %v1668_v41 = vld [vmem:[%s3892_s7 + $0x78] sm:$0xff] }
 0x256   : > { %v1163_v10 = vmul.f32 1.050701, %v1139_v16  ;;  %2410 = vpow2.f32 %v1072_v46  ;;  %v1034_v34 = vmin.f32 %v982_v24, 0.0  ;;  %vm1010_vm10 = vcmp.gt.f32.partialorder %v982_v24, 0.0 }
 0x257   : > { %v1118_v31 = vmul.f32 1.6732632, %v1941_v25  ;;  %v986_v45 = vpop.f32.mrb[30].mxu1  ;;  %v2230_v46 = vpack.c.bf16 %v1666_v20, %v1665_v30  ;;  %v1669_v25 = vld [vmem:[%s3892_s7 + $0x80] sm:$0xff] }
 0x258   : > { %v2407_v32 = vpop.eup %2406  ;;  %v1078_v35 = vmul.f32 1.442695, %v1034_v34  ;;  %v987_v37 = vadd.f32 %v986_v45, %v3536_v48  ;;  %v988_v33 = vpop.f32.mrb[31].mxu1  ;;  %1958 = vmatmul.mubr.msk.f32.gmra.mrb[34].mxu1 %vm1274_vm4, %v1163_v10  ;;  %v1670_v10 = vld [vmem:[%s3892_s7 + $0x88] sm:$0xff]  ;;  %v1672_v45 = vld [vmem:[%s3892_s7 + $0x98] sm:$0xff] }
 0x259   : > { %v1142_v8 = vsel %vm998_vm6, %v3569_v9, %v1118_v31  ;;  %v1944_v1 = vadd.f32 -1.0, %v2407_v32  ;;  %1488 = vmatprep.mubr.f32.mxu1 %v2513_v27  ;;  %v2236_v34 = vpack.c.bf16 %v1670_v10, %v1669_v25  ;;  %v1671_v31 = vld [vmem:[%s3892_s7 + $0x90] sm:$0xff] }
 0x25a   : > { %v1166_v38 = vmul.f32 1.050701, %v1142_v8  ;;  %2412 = vpow2.f32 %v1078_v35  ;;  %v1037_v55 = vmin.f32 %v987_v37, 0.0  ;;  %vm1013_vm11 = vcmp.gt.f32.partialorder %v987_v37, 0.0 }
 0x25b   : > { %v1121_v50 = vmul.f32 1.6732632, %v1944_v1  ;;  %v2239_v32 = vpack.c.bf16 %v1672_v45, %v1671_v31 }
 0x25c   : > { %v2409_v42 = vpop.eup %2408  ;;  %v1084_v43 = vmul.f32 1.442695, %v1037_v55  ;;  %1959 = vmatmul.mubr.msk.f32.gmra.mrb[36].mxu1 %vm1274_vm4, %v1166_v38 }
 0x25d   : > { %v1145_v48 = vsel %vm1001_vm7, %v3577_v40, %v1121_v50  ;;  %v1947_v53 = vadd.f32 -1.0, %v2409_v42  ;;  %1494 = vmatprep.mubr.f32.mxu1 %v2513_v27 }
 0x25e   : > { %v1169_v58 = vmul.f32 1.050701, %v1145_v48  ;;  %2414 = vpow2.f32 %v1084_v43 }
 0x25f   : > { %v1124_v9 = vmul.f32 1.6732632, %v1947_v53 }
 0x260   : > { %v2411_v47 = vpop.eup %2410  ;;  %1960 = vmatmul.mubr.msk.f32.gmra.mrb[38].mxu1 %vm1274_vm4, %v1169_v58 }
 0x261   : > { %v1148_v56 = vsel %vm1004_vm8, %v3582_v36, %v1124_v9  ;;  %v1950_v18 = vadd.f32 -1.0, %v2411_v47  ;;  %1500 = vmatprep.mubr.f32.mxu1 %v2513_v27  ;;  %v1654_v36 = vld [vmem:[%s3892_s7 + $0x8] sm:$0xff] }
 0x262   : > { %v1172_v49 = vmul.f32 1.050701, %v1148_v56  ;;  %v2212_v63 = vpack.c.bf16 %v1654_v36, %v1653_v60 }
 0x263   : > { %v1127_v51 = vmul.f32 1.6732632, %v1950_v18 }
 0x264   : > { %v2413_v52 = vpop.eup %2412  ;;  %1961 = vmatmul.mubr.msk.f32.gmra.mrb[40].mxu1 %vm1274_vm4, %v1172_v49  ;;  %2213 = vmatpush1.bf16.msra.mxu0 %v2212_v63 }
 0x265   : > { %v1151_v5 = vsel %vm1007_vm9, %v977_v7, %v1127_v51  ;;  %v1953_v12 = vadd.f32 -1.0, %v2413_v52  ;;  %1506 = vmatprep.mubr.f32.mxu1 %v2513_v27  ;;  %2251 = vmatpush1.bf16.msra.mxu1 %v2212_v63  ;;  %v2221_v7 = vpack.c.bf16 %v1660_v29, %v1659_v17 }
 0x266   : > { %v1175_v57 = vmul.f32 1.050701, %v1151_v5  ;;  %2214 = vmatprep.subr.bf16.mxu0 %v2512_v44  ;;  %2242 = vmatprep.subr.bf16.mxu1 %v2512_v44 }
 0x267   : > { %v1130_v54 = vmul.f32 1.6732632, %v1953_v12 }
 0x268   : > { %v2415_v40 = vpop.eup %2414  ;;  %1962 = vmatmul.mubr.msk.f32.gmra.mrb[42].mxu1 %vm1274_vm4, %v1175_v57 }
 0x269   : > { %v1154_v4 = vsel %vm1010_vm10, %v982_v24, %v1130_v54  ;;  %v1956_v59 = vadd.f32 -1.0, %v2415_v40  ;;  %1512 = vmatprep.mubr.f32.mxu1 %v2513_v27  ;;  %v1667_v24 = vld [vmem:[%s3892_s7 + $0x70] sm:$0xff] }
 0x26a   : > { %v1178_v61 = vmul.f32 1.050701, %v1154_v4  ;;  %v2233_v16 = vpack.c.bf16 %v1668_v41, %v1667_v24 }
 0x26b   : > { %v1133_v6 = vmul.f32 1.6732632, %v1956_v59 }
 0x26c   : > { %1963 = vmatmul.mubr.msk.f32.gmra.mrb[44].mxu1 %vm1274_vm4, %v1178_v61 }
 0x26d   : > { %v1157_v11 = vsel %vm1013_vm11, %v987_v37, %v1133_v6  ;;  %1518 = vmatprep.mubr.f32.mxu1 %v2513_v27  ;;  %v1655_v27 = vld [vmem:[%s3892_s7 + $0x10] sm:$0xff] }
 0x26e   : > { %v1181_v62 = vmul.f32 1.050701, %v1157_v11  ;;  %v2215_v23 = vpack.c.bf16 %v1656_v2, %v1655_v27 }
 0x270   : > { %1964 = vmatmul.mubr.msk.f32.gmra.mrb[46].mxu1 %vm1274_vm4, %v1181_v62  ;;  %2216 = vmatpush1.bf16.msra.mxu0 %v2215_v23 }
 0x271   : > { %2252 = vmatpush1.bf16.msra.mxu1 %v2215_v23  ;;  %2217 = vmatprep.subr.bf16.mxu0 %v2512_v44 }
 0x272   : > { %2243 = vmatprep.subr.bf16.mxu1 %v2512_v44 }
 0x274   : > { %2219 = vmatpush1.bf16.msra.mxu0 %v2218_v28 }
 0x275   : > { %2253 = vmatpush1.bf16.msra.mxu1 %v2218_v28  ;;  %2220 = vmatprep.subr.bf16.mxu0 %v2512_v44 }
 0x276   : > { %2244 = vmatprep.subr.bf16.mxu1 %v2512_v44 }
 0x278   : > { %2222 = vmatpush1.bf16.msra.mxu0 %v2221_v7 }
 0x279   : > { %2254 = vmatpush1.bf16.msra.mxu1 %v2221_v7  ;;  %2223 = vmatprep.subr.bf16.mxu0 %v2512_v44 }
 0x27a   : > { %2245 = vmatprep.subr.bf16.mxu1 %v2512_v44 }
 0x27c   : > { %2225 = vmatpush1.bf16.msra.mxu0 %v2224_v13 }
 0x27d   : > { %2255 = vmatpush1.bf16.msra.mxu1 %v2224_v13  ;;  %2226 = vmatprep.subr.bf16.mxu0 %v2512_v44 }
 0x27e   : > { %2246 = vmatprep.subr.bf16.mxu1 %v2512_v44 }
 0x280   : > { %2228 = vmatpush1.bf16.msra.mxu0 %v2227_v19 }
 0x281   : > { %2256 = vmatpush1.bf16.msra.mxu1 %v2227_v19  ;;  %2229 = vmatprep.subr.bf16.mxu0 %v2512_v44 }
 0x282   : > { %2247 = vmatprep.subr.bf16.mxu1 %v2512_v44 }
 0x284   : > { %2231 = vmatpush1.bf16.msra.mxu0 %v2230_v46 }
 0x285   : > { %2257 = vmatpush1.bf16.msra.mxu1 %v2230_v46  ;;  %2232 = vmatprep.subr.bf16.mxu0 %v2512_v44 }
 0x286   : > { %2248 = vmatprep.subr.bf16.mxu1 %v2512_v44 }
 0x288   : > { %2234 = vmatpush1.bf16.msra.mxu0 %v2233_v16 }
 0x289   : > { %2258 = vmatpush1.bf16.msra.mxu1 %v2233_v16  ;;  %2235 = vmatprep.subr.bf16.mxu0 %v2512_v44 }
 0x28a   : > { %2249 = vmatprep.subr.bf16.mxu1 %v2512_v44 }
 0x28c   : > { %2237 = vmatpush1.bf16.msra.mxu0 %v2236_v34 }
 0x28d   : > { %2259 = vmatpush1.bf16.msra.mxu1 %v2236_v34  ;;  %2238 = vmatprep.subr.bf16.mxu0 %v2512_v44 }
 0x28e   : > { %2250 = vmatprep.subr.bf16.mxu1 %v2512_v44  ;;  %v1262_v44 = vld [vmem:[%s3891_s6] sm:$0x3] }
 0x28f   : > { %v3699_v56 = vrot.slane %v1262_v44, %v3031_v21  ;;  %v3704_v49 = vrot.slane %v1262_v44, %v3043_v26 }
 0x290   : > { %2240 = vmatpush1.bf16.msra.mxu0 %v2239_v32 }
 0x291   : > { %2260 = vmatpush1.bf16.msra.mxu1 %v2239_v32 }
 0x301   : > { %v1365_v35 = vpop.f32.mrb[16].mxu0 }
 0x302   : > { %v1367_v37 = vpop.f32.mrb[17].mxu0  ;;  %v1366_v51 = vadd.f32 %v1365_v35, %v3699_v56 }
 0x303   : > { %v1368_v52 = vadd.f32 %v1367_v37, %v3704_v49 }
 0x30a   : > { %v1371_v33 = vpop.f32.mrb[18].mxu0 }
 0x30b   : > { %v1373_v8 = vpop.f32.mrb[19].mxu0  ;;  %v1372_v40 = vadd.f32 %v1371_v33, %v3699_v56 }
 0x30c   : > { %v1374_v4 = vadd.f32 %v1373_v8, %v3704_v49 }
 0x30e   : > { %v1377_v1 = vpop.f32.mrb[20].mxu0 }
 0x30f   : > { %v1379_v38 = vpop.f32.mrb[21].mxu0  ;;  %v1378_v36 = vadd.f32 %v1377_v1, %v3699_v56 }
 0x310   : > { %v1380_v27 = vadd.f32 %v1379_v38, %v3704_v49 }
 0x312   : > { %v1383_v55 = vpop.f32.mrb[22].mxu0 }
 0x313   : > { %v1385_v50 = vpop.f32.mrb[23].mxu0  ;;  %v1384_v7 = vadd.f32 %v1383_v55, %v3699_v56 }
 0x314   : > { %v1386_v39 = vadd.f32 %v1385_v50, %v3704_v49 }
 0x316   : > { %v1389_v42 = vpop.f32.mrb[24].mxu0 }
 0x317   : > { %v1391_v43 = vpop.f32.mrb[25].mxu0  ;;  %v1390_v24 = vadd.f32 %v1389_v42, %v3699_v56 }
 0x318   : > { %v1392_v16 = vadd.f32 %v1391_v43, %v3704_v49 }
 0x31a   : > { %v1395_v48 = vpop.f32.mrb[26].mxu0 }
 0x31b   : > { %v1397_v53 = vpop.f32.mrb[27].mxu0  ;;  %v1396_v31 = vadd.f32 %v1395_v48, %v3699_v56 }
 0x31c   : > { %v1398_v45 = vadd.f32 %v1397_v53, %v3704_v49 }
 0x31e   : > { %v1401_v58 = vpop.f32.mrb[28].mxu0 }
 0x31f   : > { %v3691_v9 = vpop.f32.mrb[29].mxu0  ;;  %v1402_v8 = vadd.f32 %v1401_v58, %v3699_v56 }
 0x320   : > { %v1404_v50 = vadd.f32 %v3691_v9, %v3704_v49 }
 0x322   : > { %v3696_v47 = vpop.f32.mrb[30].mxu0 }
 0x323   : > { %v3701_v18 = vpop.f32.mrb[31].mxu0  ;;  %v1408_v48 = vadd.f32 %v3696_v47, %v3699_v56 }
 0x324   : > { %v1410_v56 = vadd.f32 %v3701_v18, %v3704_v49 }
 0x327   : > { %v1478_v5 = vpop.f32.mrb[32].mxu1 }
 0x328   : > { %v3708_v12 = vadd.f32 %v1478_v5, %v1366_v51  ;;  %v1480_v57 = vpop.f32.mrb[33].mxu1 }
 0x329   : > { %v3710_v54 = vadd.f32 %v1480_v57, %v1368_v52 }
 0x32a   : > { %v1541_v21 = vmin.f32 %v3708_v12, 0.0  ;;  %vm1525_vm12 = vcmp.gt.f32.partialorder %v3708_v12, 0.0 }
 0x32b   : > { %v1542_v59 = vmin.f32 %v3710_v54, 0.0  ;;  %v1484_v26 = vpop.f32.mrb[34].mxu1  ;;  %vm1526_vm13 = vcmp.gt.f32.partialorder %v3710_v54, 0.0 }
 0x32c   : > { %v1557_v61 = vmul.f32 1.442695, %v1541_v21  ;;  %v3716_v6 = vadd.f32 %v1484_v26, %v1372_v40  ;;  %v1486_v11 = vpop.f32.mrb[35].mxu1 }
 0x32d   : > { %v1559_v62 = vmul.f32 1.442695, %v1542_v59  ;;  %v3718_v60 = vadd.f32 %v1486_v11, %v1374_v4 }
 0x32e   : > { %2416 = vpow2.f32 %v1557_v61  ;;  %v1543_v63 = vmin.f32 %v3716_v6, 0.0  ;;  %vm1527_vm14 = vcmp.gt.f32.partialorder %v3716_v6, 0.0 }
 0x32f   : > { %2418 = vpow2.f32 %v1559_v62  ;;  %v1544_v2 = vmin.f32 %v3718_v60, 0.0  ;;  %v1490_v23 = vpop.f32.mrb[36].mxu1  ;;  %vm1528_vm15 = vcmp.gt.f32.partialorder %v3718_v60, 0.0 }
 0x330   : > { %v1561_v3 = vmul.f32 1.442695, %v1543_v63  ;;  %v3724_v14 = vadd.f32 %v1490_v23, %v1378_v36  ;;  %v1492_v28 = vpop.f32.mrb[37].mxu1 }
 0x331   : > { %v1563_v17 = vmul.f32 1.442695, %v1544_v2  ;;  %v3726_v29 = vadd.f32 %v1492_v28, %v1380_v27 }
 0x332   : > { %2420 = vpow2.f32 %v1561_v3  ;;  %v1545_v22 = vmin.f32 %v3724_v14, 0.0  ;;  %vm1529_vm1 = vcmp.gt.f32.partialorder %v3724_v14, 0.0 }
 0x333   : > { %2422 = vpow2.f32 %v1563_v17  ;;  %v1546_v13 = vmin.f32 %v3726_v29, 0.0  ;;  %v1496_v15 = vpop.f32.mrb[38].mxu1  ;;  %vm1530_vm2 = vcmp.gt.f32.partialorder %v3726_v29, 0.0 }
 0x334   : > { %v1565_v0 = vmul.f32 1.442695, %v1545_v22  ;;  %v3732_v19 = vadd.f32 %v1496_v15, %v1384_v7  ;;  %v1498_v30 = vpop.f32.mrb[39].mxu1 }
 0x335   : > { %v1567_v20 = vmul.f32 1.442695, %v1546_v13  ;;  %v3734_v46 = vadd.f32 %v1498_v30, %v1386_v39 }
 0x336   : > { %2424 = vpow2.f32 %v1565_v0  ;;  %v1547_v41 = vmin.f32 %v3732_v19, 0.0  ;;  %vm1531_vm4 = vcmp.gt.f32.partialorder %v3732_v19, 0.0 }
 0x337   : > { %2426 = vpow2.f32 %v1567_v20  ;;  %v1548_v25 = vmin.f32 %v3734_v46, 0.0  ;;  %v1502_v10 = vpop.f32.mrb[40].mxu1  ;;  %vm1532_vm3 = vcmp.gt.f32.partialorder %v3734_v46, 0.0 }
 0x338   : > { %v2417_v34 = vpop.eup %2416  ;;  %v1569_v32 = vmul.f32 1.442695, %v1547_v41  ;;  %v3742_v35 = vadd.f32 %v1502_v10, %v1390_v24  ;;  %v1504_v37 = vpop.f32.mrb[41].mxu1 }
 0x339   : > { %v2419_v33 = vpop.eup %2418  ;;  %v1965_v1 = vadd.f32 -1.0, %v2417_v34  ;;  %v1571_v38 = vmul.f32 1.442695, %v1548_v25  ;;  %v3745_v55 = vadd.f32 %v1504_v37, %v1392_v16 }
 0x33a   : > { %v1966_v42 = vadd.f32 -1.0, %v2419_v33  ;;  %2428 = vpow2.f32 %v1569_v32  ;;  %v1549_v43 = vmin.f32 %v3742_v35, 0.0  ;;  %vm1533_vm5 = vcmp.gt.f32.partialorder %v3742_v35, 0.0 }
 0x33b   : > { %v1605_v53 = vmul.f32 1.6732632, %v1965_v1  ;;  %2430 = vpow2.f32 %v1571_v38  ;;  %v1550_v44 = vmin.f32 %v3745_v55, 0.0  ;;  %v1508_v51 = vpop.f32.mrb[42].mxu1  ;;  %vm1534_vm6 = vcmp.gt.f32.partialorder %v3745_v55, 0.0 }
 0x33c   : > { %v2421_v58 = vpop.eup %2420  ;;  %v1606_v52 = vmul.f32 1.6732632, %v1966_v42  ;;  %v1573_v5 = vmul.f32 1.442695, %v1549_v43  ;;  %v3754_v57 = vadd.f32 %v1508_v51, %v1396_v31  ;;  %v1510_v9 = vpop.f32.mrb[43].mxu1 }
 0x33d   : > { %v2423_v40 = vpop.eup %2422  ;;  %v1621_v21 = vsel %vm1525_vm12, %v3708_v12, %v1605_v53  ;;  %v1575_v4 = vmul.f32 1.442695, %v1550_v44  ;;  %v3758_v47 = vadd.f32 %v1510_v9, %v1398_v45  ;;  %v1967_v11 = vadd.f32 -1.0, %v2421_v58 }
 0x33e   : > { %v1622_v59 = vsel %vm1526_vm13, %v3710_v54, %v1606_v52  ;;  %v1968_v26 = vadd.f32 -1.0, %v2423_v40  ;;  %2432 = vpow2.f32 %v1573_v5  ;;  %v1551_v62 = vmin.f32 %v3754_v57, 0.0 }
 0x33f   : > { %v1638_v61 = vmul.f32 1.050701, %v1622_v59  ;;  %2434 = vpow2.f32 %v1575_v4  ;;  %v1514_v12 = vpop.f32.mrb[44].mxu1  ;;  %v1637_v63 = vmul.f32 1.050701, %v1621_v21  ;;  %v1552_v2 = vmin.f32 %v3758_v47, 0.0 }
 0x340   : > { %v2425_v36 = vpop.eup %2424  ;;  %v1608_v27 = vmul.f32 1.6732632, %v1968_v26  ;;  %v3766_v23 = vadd.f32 %v1514_v12, %v1402_v8  ;;  %v1516_v18 = vpop.f32.mrb[45].mxu1  ;;  %v1577_v3 = vmul.f32 1.442695, %v1551_v62  ;;  %vm1535_vm7 = vcmp.gt.f32.partialorder %v3754_v57, 0.0 }
 0x341   : > { %v2427_v49 = vpop.eup %2426  ;;  %v1969_v54 = vadd.f32 -1.0, %v2425_v36  ;;  %v3769_v28 = vadd.f32 %v1516_v18, %v1404_v50  ;;  %1982 = vmatprep.mubr.msk.f32.mxu0 %vm747_vm0, %v1638_v61  ;;  %v1579_v22 = vmul.f32 1.442695, %v1552_v2  ;;  %v1607_v16 = vmul.f32 1.6732632, %v1967_v11 }
 0x342   : > { %v1624_v17 = vsel %vm1528_vm15, %v3718_v60, %v1608_v27  ;;  %v1970_v7 = vadd.f32 -1.0, %v2427_v49  ;;  %1769 = vmatmul.mubr.f32.vlgmr.msra.gmra.mrb[32].mxu0 %v1637_v63  ;;  %2436 = vpow2.f32 %v1577_v3  ;;  %v1553_v15 = vmin.f32 %v3766_v23, 0.0 }
 0x343   : > { %v1640_v39 = vmul.f32 1.050701, %v1624_v17  ;;  %v1609_v13 = vmul.f32 1.6732632, %v1969_v54  ;;  %v1520_v0 = vpop.f32.mrb[46].mxu1  ;;  %2438 = vpow2.f32 %v1579_v22  ;;  %v1554_v24 = vmin.f32 %v3769_v28, 0.0 }
 0x344   : > { %v2429_v30 = vpop.eup %2428  ;;  %v1610_v20 = vmul.f32 1.6732632, %v1970_v7  ;;  %v1522_v41 = vpop.f32.mrb[47].mxu1  ;;  %v1581_v10 = vmul.f32 1.442695, %v1553_v15  ;;  %v3780_v34 = vadd.f32 %v1520_v0, %v1408_v48  ;;  %v1623_v42 = vsel %vm1527_vm14, %v3716_v6, %v1607_v16 }
 0x345   : > { %v2431_v25 = vpop.eup %2430  ;;  %v1625_v60 = vsel %vm1529_vm1, %v3724_v14, %v1609_v13  ;;  %1983 = vmatprep.mubr.msk.f32.mxu0 %vm747_vm0, %v1640_v39  ;;  %v1971_v45 = vadd.f32 -1.0, %v2429_v30  ;;  %v1583_v37 = vmul.f32 1.442695, %v1554_v24  ;;  %v3785_v14 = vadd.f32 %v1522_v41, %v1410_v56  ;;  %v1981_v16 = vld [vmem:[%s3893_s8] ss:$0 sm:$0xff] }
 0x346   : > { %v1626_v31 = vsel %vm1530_vm2, %v3726_v29, %v1610_v20  ;;  %v1972_v32 = vadd.f32 -1.0, %v2431_v25  ;;  %v1641_v33 = vmul.f32 1.050701, %v1625_v60  ;;  %2440 = vpow2.f32 %v1581_v10 }
 0x347   : > { %v1642_v8 = vmul.f32 1.050701, %v1626_v31  ;;  %v1555_v1 = vmin.f32 %v3780_v34, 0.0  ;;  %2442 = vpow2.f32 %v1583_v37  ;;  %v1639_v53 = vmul.f32 1.050701, %v1623_v42 }
 0x348   : > { %v2433_v38 = vpop.eup %2432  ;;  %v1612_v50 = vmul.f32 1.6732632, %v1972_v32  ;;  %v1556_v58 = vmin.f32 %v3785_v14, 0.0  ;;  %v1611_v5 = vmul.f32 1.6732632, %v1971_v45  ;;  %vm1536_vm8 = vcmp.gt.f32.partialorder %v3758_v47, 0.0 }
 0x349   : > { %v2435_v43 = vpop.eup %2434  ;;  %v1973_v29 = vadd.f32 -1.0, %v2433_v38  ;;  %v1585_v48 = vmul.f32 1.442695, %v1555_v1  ;;  %1984 = vmatprep.mubr.msk.f32.mxu1 %vm747_vm0, %v1642_v8  ;;  %1774 = vmatmul.mubr.f32.gmra.mrb[34].mxu0 %v1639_v53  ;;  %vm1537_vm9 = vcmp.gt.f32.partialorder %v3766_v23, 0.0  ;;  %vm1538_vm10 = vcmp.gt.f32.partialorder %v3769_v28, 0.0 }
 0x34a   : > { %v1628_v44 = vsel %vm1532_vm3, %v3734_v46, %v1612_v50  ;;  %v1974_v51 = vadd.f32 -1.0, %v2435_v43  ;;  %1779 = vmatmul.mubr.f32.vlgmr.msra.gmra.mrb[48].mxu1 %v1641_v33  ;;  %v1587_v40 = vmul.f32 1.442695, %v1556_v58  ;;  %v1627_v46 = vsel %vm1531_vm4, %v3732_v19, %v1611_v5 }
 0x34b   : > { %v1644_v52 = vmul.f32 1.050701, %v1628_v44  ;;  %2444 = vpow2.f32 %v1585_v48  ;;  %v1613_v9 = vmul.f32 1.6732632, %v1973_v29  ;;  %v1643_v26 = vmul.f32 1.050701, %v1627_v46 }
 0x34c   : > { %v1614_v6 = vmul.f32 1.6732632, %v1974_v51  ;;  %v2437_v21 = vpop.eup %2436  ;;  %2446 = vpow2.f32 %v1587_v40  ;;  %vm1539_vm11 = vcmp.gt.f32.partialorder %v3780_v34, 0.0  ;;  %vm1540_vm12 = vcmp.gt.f32.partialorder %v3785_v14, 0.0 }
 0x34d   : > { %1985 = vmatprep.mubr.msk.f32.mxu1 %vm747_vm0, %v1644_v52  ;;  %v2439_v4 = vpop.eup %2438  ;;  %v1975_v59 = vadd.f32 -1.0, %v2437_v21  ;;  %v1629_v62 = vsel %vm1533_vm5, %v3742_v35, %v1613_v9 }
 0x34e   : > { %v1630_v56 = vsel %vm1534_vm6, %v3745_v55, %v1614_v6  ;;  %v1976_v11 = vadd.f32 -1.0, %v2439_v4  ;;  %1784 = vmatmul.mubr.f32.gmra.mrb[50].mxu1 %v1643_v26  ;;  %v1645_v55 = vmul.f32 1.050701, %v1629_v62 }
 0x34f   : > { %v1646_v61 = vmul.f32 1.050701, %v1630_v56  ;;  %v1615_v12 = vmul.f32 1.6732632, %v1975_v59 }
 0x350   : > { %v2441_v36 = vpop.eup %2440  ;;  %v1616_v63 = vmul.f32 1.6732632, %v1976_v11 }
 0x351   : > { %1986 = vmatprep.mubr.msk.f32.mxu1 %vm747_vm0, %v1646_v61  ;;  %v2443_v27 = vpop.eup %2442  ;;  %v1977_v19 = vadd.f32 -1.0, %v2441_v36  ;;  %v1631_v49 = vsel %vm1535_vm7, %v3754_v57, %v1615_v12 }
 0x352   : > { %v1632_v2 = vsel %vm1536_vm8, %v3758_v47, %v1616_v63  ;;  %v1978_v18 = vadd.f32 -1.0, %v2443_v27  ;;  %1789 = vmatmul.mubr.f32.gmra.mrb[52].mxu1 %v1645_v55  ;;  %v1647_v22 = vmul.f32 1.050701, %v1631_v49 }
 0x353   : > { %v1648_v54 = vmul.f32 1.050701, %v1632_v2  ;;  %v1617_v35 = vmul.f32 1.6732632, %v1977_v19 }
 0x354   : > { %v1618_v17 = vmul.f32 1.6732632, %v1978_v18 }
 0x355   : > { %v2445_v3 = vpop.eup %2444  ;;  %1987 = vmatprep.mubr.msk.f32.mxu1 %vm747_vm0, %v1648_v54  ;;  %v1633_v47 = vsel %vm1537_vm9, %v3766_v23, %v1617_v35 }
 0x356   : > { %v1979_v7 = vadd.f32 -1.0, %v2445_v3  ;;  %v1634_v39 = vsel %vm1538_vm10, %v3769_v28, %v1618_v17  ;;  %v2447_v13 = vpop.eup %2446  ;;  %1794 = vmatmul.mubr.f32.gmra.mrb[54].mxu1 %v1647_v22  ;;  %v1649_v30 = vmul.f32 1.050701, %v1633_v47 }
 0x357   : > { %v1650_v15 = vmul.f32 1.050701, %v1634_v39  ;;  %v1980_v0 = vadd.f32 -1.0, %v2447_v13 }
 0x358   : > { %v1619_v57 = vmul.f32 1.6732632, %v1979_v7 }
 0x359   : > { %1988 = vmatprep.mubr.msk.f32.mxu1 %vm747_vm0, %v1650_v15  ;;  %v1620_v20 = vmul.f32 1.6732632, %v1980_v0 }
 0x35a   : > { %1799 = vmatmul.mubr.f32.gmra.mrb[56].mxu1 %v1649_v30  ;;  %v1635_v28 = vsel %vm1539_vm11, %v3780_v34, %v1619_v57 }
 0x35b   : > { %v1636_v23 = vsel %vm1540_vm12, %v3785_v14, %v1620_v20  ;;  %v1651_v41 = vmul.f32 1.050701, %v1635_v28 }
 0x35c   : > { %v1652_v24 = vmul.f32 1.050701, %v1636_v23 }
 0x35e   : > { %1989 = vmatprep.mubr.msk.f32.mxu1 %vm747_vm0, %v1652_v24 }
 0x35f   : > { %1804 = vmatmul.mubr.f32.gmra.mrb[58].mxu1 %v1651_v41 }
 0x415   : > { %v1770_v25 = vpop.f32.mrb[32].mxu0 }
 0x416   : > { %v1771_v60 = vadd.f32 %v1981_v16, %v1770_v25  ;;  %v1772_v10 = vpop.f32.mrb[33].mxu0 }
 0x418   : > { %1809 = vst [vmem:[%s3823_s21] sm:$0xff] %v1771_v60 }
 0x41c   : > { %v1775_v31 = vpop.f32.mrb[34].mxu0 }
 0x41d   : > { %v1780_v34 = vpop.f32.mrb[48].mxu1  ;;  %v1776_v37 = vadd.f32 %v1981_v16, %v1775_v31  ;;  %v1777_v33 = vpop.f32.mrb[35].mxu0 }
 0x41e   : > { %v1781_v45 = vadd.f32 %v1981_v16, %v1780_v34  ;;  %v1782_v32 = vpop.f32.mrb[49].mxu1 }
 0x41f   : > { %1810 = vst [vmem:[%s3823_s21 + $0x8] sm:$0xff] %v1776_v37 }
 0x420   : > { %1811 = vst [vmem:[%s3823_s21 + $0x10] sm:$0xff] %v1781_v45 }
 0x421   : > { %v1785_v8 = vpop.f32.mrb[50].mxu1 }
 0x422   : > { %v1786_v1 = vadd.f32 %v1981_v16, %v1785_v8  ;;  %v1787_v38 = vpop.f32.mrb[51].mxu1 }
 0x424   : > { %1812 = vst [vmem:[%s3823_s21 + $0x18] sm:$0xff] %v1786_v1 }
 0x425   : > { %v1790_v50 = vpop.f32.mrb[52].mxu1 }
 0x426   : > { %v1791_v14 = vadd.f32 %v1981_v16, %v1790_v50  ;;  %v1792_v42 = vpop.f32.mrb[53].mxu1 }
 0x428   : > { %1813 = vst [vmem:[%s3823_s21 + $0x20] sm:$0xff] %v1791_v14 }
 0x429   : > { %v1795_v43 = vpop.f32.mrb[54].mxu1 }
 0x42a   : > { %v1796_v29 = vadd.f32 %v1981_v16, %v1795_v43  ;;  %v1797_v48 = vpop.f32.mrb[55].mxu1 }
 0x42c   : > { %1814 = vst [vmem:[%s3823_s21 + $0x28] sm:$0xff] %v1796_v29 }
 0x42d   : > { %v1800_v53 = vpop.f32.mrb[56].mxu1 }
 0x42e   : > { %v1801_v44 = vadd.f32 %v1981_v16, %v1800_v53  ;;  %v1802_v51 = vpop.f32.mrb[57].mxu1 }
 0x430   : > { %1815 = vst [vmem:[%s3823_s21 + $0x30] sm:$0xff] %v1801_v44 }
 0x432   : > { %v1805_v58 = vpop.f32.mrb[58].mxu1 }
 0x433   : > { %v1806_v52 = vadd.f32 %v1981_v16, %v1805_v58  ;;  %v1807_v5 = vpop.f32.mrb[59].mxu1 }
 0x435   : > { %1816 = vst [vmem:[%s3823_s21 + $0x38] sm:$0xff] %v1806_v52 }
 0x436   : > { %2461 = shalt.err (!%p2458_p3)
}
 0x437   : > { %s2462_s16 = scalar_lea.hbm %s3837_s0, 1024  ;;  %s2466_s21 = scalar_lea.hbm %s3894_s9, 2048 }
 0x438   : > { %p2463_p4 = scmp.ne.s32.totalorder %s3837_s0, %s2462_s16  ;;  %p2467_p9 = scmp.lt.u32.totalorder %s3837_s0, %s3894_s9 }
 0x439   : > { %p2468_p10 = scmp.lt.u32.totalorder %s2466_s21, %s2462_s16  ;;  %p2470_p12 = scmp.lt.u32.totalorder %s2462_s16, %s3837_s0 }
 0x43a   : > { %p2464_p7 = pnand %p2463_p4, %p2605_p5 }
 0x43b   : > { %p2469_p11 = por %p2468_p10, %p2467_p9 }
 0x43c   : > { %p2465_p8 = pneg %p2464_p7 }
 0x43d   : > { %p2471_p13 = por %p2470_p12, %p2469_p11 }
 0x43f   : > { %p2472_p0 = pnand %p2471_p13, %p2465_p8 }
 0x441   : > { %2475 = shalt.err (!%p2472_p0)
}
 0x442   : > { %s2515_s25 = smov 128   ;;  %s2516_s13 = smov 8  }
 0x443   : > { %2293 = dma.vmem_to_hbm [thread:$0]  (%p2605_p5), %s3839_s23, 1024, %s3837_s0, %s3844_s26, %s2515_s25, %s2515_s25, %s2516_s13  }
 0x444 PF: > { %p2299_p1 = scmp.ge.s32.totalorder %s2510_s12, 2  ;;  %s1846_s17 = sand.u32 1, %s2498_s30  }
 0x445   : > { %s1847_s27 = scalar_lea.sflag [#allocation3], %s1846_s17 }
 0x446   : > { %p2296_p2 = pnand %p2299_p1, %p2609_p6 }
 0x448   : > { %2493 = dma.done.wait (!%p2296_p2), %s1847_s27, 1024  }
 0x449   : > { %2495 = vsyncadd (!%p2296_p2), %s1847_s27, 4294966272  ;;  %p19_p3 = scmp.ge.s32.totalorder %s2592_s15, 4   ;;  %s3899_s30 = smov %s2502_s10 }
 0x44a   : > { %s3900_s10 = smov %s2506_s11  ;;  %s3901_s11 = smov %s2603_s18 }
 0x44b   : > { %s3902_s12 = smov %s2592_s15  ;;  %21 = sbr.rel (!%p19_p3) target bundleno = 5 (0x5), region = 91 }
 0x452   :  { %1852 = vsyncpa [#allocation3], 1 }
 0x453   :  { %1854 = vsyncpa [#allocation3 + $0x1], 1 }

</bundles_post_ra>
